<compile_context>
chip_gen: v6e
topology: v6e:2x2x1
jax: 0.10.0
libtpu: 0.0.40
codegen_flags: <defaults>
</compile_context>

<pallas_src>
import functools

import jax
import jax.numpy as jnp
from jax.experimental import pallas as pl
from jax.experimental.pallas import tpu as pltpu


def _round_up(x, m):
    return (x + m - 1) // m * m


def _n2h_kernel(x_ref, w1_ref, b1_ref, w2_ref, b2_ref, o_ref, acc_ref, *,
                bound, afunc):
    k = pl.program_id(1)

    @pl.when(k == 0)
    def _():
        acc_ref[...] = jnp.zeros_like(acc_ref)

    # Layer-1 partial accumulate on the MXU: (tm, tk) @ (tk, N1p) -> f32 acc.
    acc_ref[...] += jnp.dot(x_ref[...], w1_ref[...],
                            preferred_element_type=jnp.float32,
                            precision=jax.lax.Precision.HIGHEST)

    @pl.when(k == pl.num_programs(1) - 1)
    def _():
        # Finalize (once per row tile): bias1 + afunc (EUP), block-diagonal
        # layer-2 matmul (MXU), bias2, hardtanh clamp (VPU) -> lane-dense store.
        h = afunc(acc_ref[...] + b1_ref[...])
        y = jnp.dot(h.astype(w2_ref.dtype), w2_ref[...],
                    preferred_element_type=jnp.float32,
                    precision=jax.lax.Precision.HIGHEST)
        y = y + b2_ref[...]
        o_ref[...] = jnp.clip(y, -bound, bound).astype(o_ref.dtype)


def n2h_forward(x, weight1, bias1, weight2, bias2, bound, afunc=jnp.tanh,
                use_bf16=False):
    """Pallas forward of N2h.

    x:       (B, C, H, W)        weight1: (dim_out, dim_in, M)
    bias1:   (dim_out, 1, M)     weight2: (dim_out, M, 1)
    bias2:   (dim_out, 1, 1)
    returns: (B, dim_out)
    """
    B = x.shape[0]
    dim_out, dim_in, M = weight1.shape
    x2d = x.reshape(B, -1)
    assert x2d.shape[1] == dim_in

    N1 = dim_out * M

    # --- repack params into lane-friendly 2-D slabs (glue, outside kernel) ---
    # W1r[d, o*M+m] = weight1[o, d, m]
    w1_r = jnp.transpose(weight1, (1, 0, 2)).reshape(dim_in, N1)
    b1_r = bias1.reshape(1, N1)
    # Block-diagonal layer-2: W2blk[o*M+m, o] = weight2[o, m, 0]
    rows = jnp.arange(N1)
    w2_blk = jnp.zeros((N1, dim_out), weight2.dtype).at[rows, rows // M].set(
        weight2.reshape(N1))
    b2_r = bias2.reshape(1, dim_out)

    # --- tile sizes & zero-padding to lane/sublane-dense shapes --------------
    sub = 16 if use_bf16 else 8
    tm = min(256, _round_up(B, sub))
    Bp = _round_up(B, tm)
    if dim_in <= 512:
        tk = _round_up(dim_in, 128)
        Kp = tk
    else:
        tk = 512
        Kp = _round_up(dim_in, tk)
    N1p = _round_up(N1, 128)
    N2p = _round_up(dim_out, 128)

    mxu_dtype = jnp.bfloat16 if use_bf16 else jnp.float32
    x_p = jnp.zeros((Bp, Kp), mxu_dtype).at[:B, :dim_in].set(
        x2d.astype(mxu_dtype))
    w1_p = jnp.zeros((Kp, N1p), mxu_dtype).at[:dim_in, :N1].set(
        w1_r.astype(mxu_dtype))
    b1_p = jnp.zeros((1, N1p), jnp.float32).at[:, :N1].set(
        b1_r.astype(jnp.float32))
    w2_p = jnp.zeros((N1p, N2p), mxu_dtype).at[:N1, :dim_out].set(
        w2_blk.astype(mxu_dtype))
    b2_p = jnp.zeros((1, N2p), jnp.float32).at[:, :dim_out].set(
        b2_r.astype(jnp.float32))

    grid = (Bp // tm, Kp // tk)
    kernel = functools.partial(_n2h_kernel, bound=float(bound), afunc=afunc)

    itemsize = jnp.dtype(mxu_dtype).itemsize
    vmem_est = (2 * (tm * tk + tk * N1p + N1p * N2p) * itemsize
                + 2 * (N1p + N2p) * 4
                + 2 * tm * N2p * 4
                + tm * N1p * 4)
    vmem_limit = int(min(max(4 * vmem_est, 16 * 1024 * 1024), 48 * 1024 * 1024))

    cost = pl.CostEstimate(
        flops=2 * B * dim_in * N1 + 2 * B * N1 * dim_out,
        transcendentals=B * N1,
        bytes_accessed=4 * (B * dim_in + dim_in * N1 + N1 + N1 * dim_out
                            + dim_out + B * dim_out),
    )

    out_p = pl.pallas_call(
        kernel,
        out_shape=jax.ShapeDtypeStruct((Bp, N2p), jnp.float32),
        grid=grid,
        in_specs=[
            pl.BlockSpec((tm, tk), lambda i, k: (i, k)),     # x tile
            pl.BlockSpec((tk, N1p), lambda i, k: (k, 0)),    # W1 tile
            pl.BlockSpec((1, N1p), lambda i, k: (0, 0)),     # b1 (resident)
            pl.BlockSpec((N1p, N2p), lambda i, k: (0, 0)),   # W2 block-diag
            pl.BlockSpec((1, N2p), lambda i, k: (0, 0)),     # b2 (resident)
        ],
        out_specs=pl.BlockSpec((tm, N2p), lambda i, k: (i, 0)),
        scratch_shapes=[pltpu.VMEM((tm, N1p), jnp.float32)],
        compiler_params=pltpu.CompilerParams(
            dimension_semantics=("parallel", "arbitrary"),
            vmem_limit_bytes=vmem_limit),
        cost_estimate=cost,
    )(x_p, w1_p, b1_p, w2_p, b2_p)

    return out_p[:B, :dim_out]


if __name__ == "__main__":
    # Module config mirroring N2h.__init__ (zero=False), afunc = tanh.
    shape_in = (4, 16, 16)            # per-sample input shape (C, H, W)
    dim_in = 4 * 16 * 16              # dim(shape_in) = 1024
    dim_out = 8
    module_size = 4                   # must be >= 2
    bound = 2.5
    afunc = jnp.tanh                  # the `afunc` constructor argument
    B = 2

    key = jax.random.PRNGKey(0)
    kx, k1, kb1, k2, kb2 = jax.random.split(key, 5)

    std = 1.0 / (dim_in ** 0.5)
    weight1 = jax.random.uniform(k1, (dim_out, dim_in, module_size),
                                 minval=-std, maxval=std, dtype=jnp.float32)
    bias1 = jax.random.uniform(kb1, (dim_out, 1, module_size),
                               minval=-std, maxval=std, dtype=jnp.float32)
    weight2 = jax.random.uniform(k2, (dim_out, module_size, 1),
                                 minval=-std, maxval=std, dtype=jnp.float32)
    bias2 = jax.random.uniform(kb2, (dim_out, 1, 1),
                               minval=-std, maxval=std, dtype=jnp.float32)

    x = jax.random.normal(kx, (B,) + shape_in, dtype=jnp.float32)

    out = n2h_forward(x, weight1, bias1, weight2, bias2, bound, afunc=afunc)
    out = jax.block_until_ready(out)

    # Pure-JAX reference mirroring the PyTorch forward exactly.
    x2d = x.reshape(B, -1)
    h = afunc(jnp.einsum('bd,odm->obm', x2d, weight1,
                         precision=jax.lax.Precision.HIGHEST) + bias1)
    y = jnp.einsum('obm,omk->obk', h, weight2,
                   precision=jax.lax.Precision.HIGHEST) + bias2
    y = jnp.clip(y, -bound, bound)
    ref = jnp.transpose(y[:, :, 0], (1, 0))          # (B, dim_out)

    assert out.shape == (B, dim_out)
    assert jnp.allclose(out, ref, atol=1e-5, rtol=1e-5), (
        float(jnp.max(jnp.abs(out - ref))))

    print("KERNEL_OK")
</pallas_src>

<mosaic_0001>
module attributes {stable_mosaic.version = 11 : i64} {
  func.func @_n2h_kernel(%arg0: i32, %arg1: i32, %arg2: memref<8x512xf32, #tpu.memory_space<vmem>>, %arg3: memref<512x128xf32, #tpu.memory_space<vmem>>, %arg4: memref<1x128xf32, #tpu.memory_space<vmem>>, %arg5: memref<128x128xf32, #tpu.memory_space<vmem>>, %arg6: memref<1x128xf32, #tpu.memory_space<vmem>>, %arg7: memref<8x128xf32, #tpu.memory_space<vmem>>, %arg8: memref<8x128xf32, #tpu.memory_space<vmem>>) attributes {dimension_semantics = [#tpu.dimension_semantics<parallel>, #tpu.dimension_semantics<arbitrary>], iteration_bounds = array<i64: 1, 2>, scalar_prefetch = 0 : i64, scratch_operands = 1 : i64, tpu.core_type = #tpu.core_type<tc>, window_params = [{transform_indices = @transform_0, window_bounds = array<i64: 8, 512>}, {transform_indices = @transform_1, window_bounds = array<i64: 512, 128>}, {pipeline_mode = #tpu.pipeline_mode<synchronous>, transform_indices = @transform_2, window_bounds = array<i64: 1, 128>}, {pipeline_mode = #tpu.pipeline_mode<synchronous>, transform_indices = @transform_3, window_bounds = array<i64: 128, 128>}, {pipeline_mode = #tpu.pipeline_mode<synchronous>, transform_indices = @transform_4, window_bounds = array<i64: 1, 128>}, {transform_indices = @transform_5, window_bounds = array<i64: 8, 128>}]} {
    %c0_i32 = arith.constant 0 : i32
    %0 = arith.cmpi eq, %arg1, %c0_i32 : i32
    %1 = arith.extui %0 : i1 to i32
    %c0_i32_0 = arith.constant 0 : i32
    %2 = arith.cmpi ne, %1, %c0_i32_0 : i32
    scf.if %2 {
      %cst_9 = arith.constant 0.000000e+00 : f32
      %12 = vector.broadcast %cst_9 : f32 to vector<8x128xf32>
      %c0_10 = arith.constant 0 : index
      %c0_11 = arith.constant 0 : index
      %13 = vector.load %arg8[%c0_10, %c0_11] : memref<8x128xf32, #tpu.memory_space<vmem>>, vector<8x128xf32>
      tpu.vector_store %arg8[%c0_10, %c0_11], %12 {strides = array<i32>} : memref<8x128xf32, #tpu.memory_space<vmem>>, vector<8x128xf32>,
    } else {
    }
    %c0 = arith.constant 0 : index
    %c0_1 = arith.constant 0 : index
    %3 = vector.load %arg8[%c0, %c0_1] : memref<8x128xf32, #tpu.memory_space<vmem>>, vector<8x128xf32>
    %c0_2 = arith.constant 0 : index
    %c0_3 = arith.constant 0 : index
    %4 = vector.load %arg2[%c0_2, %c0_3] : memref<8x512xf32, #tpu.memory_space<vmem>>, vector<8x512xf32>
    %c0_4 = arith.constant 0 : index
    %c0_5 = arith.constant 0 : index
    %5 = vector.load %arg3[%c0_4, %c0_5] : memref<512x128xf32, #tpu.memory_space<vmem>>, vector<512x128xf32>
    %cst = arith.constant dense<0.000000e+00> : vector<8x128xf32>
    %6 = tpu.matmul %4, %5, %cst {dimension_numbers = #tpu.dot_dimension_numbers<[1], [0], [0], [1], [0, 0, 1, 1], [], []>, precision = #tpu.contract_precision<fp32>} : vector<8x512xf32>, vector<512x128xf32>, vector<8x128xf32> -> vector<8x128xf32>
    %7 = arith.addf %3, %6 : vector<8x128xf32>
    %c0_6 = arith.constant 0 : index
    %c0_7 = arith.constant 0 : index
    %8 = vector.load %arg8[%c0_6, %c0_7] : memref<8x128xf32, #tpu.memory_space<vmem>>, vector<8x128xf32>
    tpu.vector_store %arg8[%c0_6, %c0_7], %7 {strides = array<i32>} : memref<8x128xf32, #tpu.memory_space<vmem>>, vector<8x128xf32>,
    %c1_i32 = arith.constant 1 : i32
    %9 = arith.cmpi eq, %arg1, %c1_i32 : i32
    %10 = arith.extui %9 : i1 to i32
    %c0_i32_8 = arith.constant 0 : i32
    %11 = arith.cmpi ne, %10, %c0_i32_8 : i32
    scf.if %11 {
      %c0_9 = arith.constant 0 : index
      %c0_10 = arith.constant 0 : index
      %12 = vector.load %arg8[%c0_9, %c0_10] : memref<8x128xf32, #tpu.memory_space<vmem>>, vector<8x128xf32>
      %c0_11 = arith.constant 0 : index
      %c0_12 = arith.constant 0 : index
      %13 = vector.load %arg4[%c0_11, %c0_12] : memref<1x128xf32, #tpu.memory_space<vmem>>, vector<1x128xf32>
      %14 = vector.broadcast %13 : vector<1x128xf32> to vector<8x128xf32>
      %15 = arith.addf %12, %14 : vector<8x128xf32>
      %16 = math.tanh %15 : vector<8x128xf32>
      %c0_13 = arith.constant 0 : index
      %c0_14 = arith.constant 0 : index
      %17 = vector.load %arg5[%c0_13, %c0_14] : memref<128x128xf32, #tpu.memory_space<vmem>>, vector<128x128xf32>
      %cst_15 = arith.constant dense<0.000000e+00> : vector<8x128xf32>
      %18 = tpu.matmul %16, %17, %cst_15 {dimension_numbers = #tpu.dot_dimension_numbers<[1], [0], [0], [1], [0, 0, 1, 1], [], []>, precision = #tpu.contract_precision<fp32>} : vector<8x128xf32>, vector<128x128xf32>, vector<8x128xf32> -> vector<8x128xf32>
      %c0_16 = arith.constant 0 : index
      %c0_17 = arith.constant 0 : index
      %19 = vector.load %arg6[%c0_16, %c0_17] : memref<1x128xf32, #tpu.memory_space<vmem>>, vector<1x128xf32>
      %20 = vector.broadcast %19 : vector<1x128xf32> to vector<8x128xf32>
      %21 = arith.addf %18, %20 : vector<8x128xf32>
      %cst_18 = arith.constant -2.500000e+00 : f32
      %cst_19 = arith.constant 2.500000e+00 : f32
      %22 = vector.broadcast %cst_18 : f32 to vector<8x128xf32>
      %23 = arith.maximumf %22, %21 : vector<8x128xf32>
      %24 = vector.broadcast %cst_19 : f32 to vector<8x128xf32>
      %25 = arith.minimumf %24, %23 : vector<8x128xf32>
      %c0_20 = arith.constant 0 : index
      %c0_21 = arith.constant 0 : index
      %26 = vector.load %arg7[%c0_20, %c0_21] : memref<8x128xf32, #tpu.memory_space<vmem>>, vector<8x128xf32>
      tpu.vector_store %arg7[%c0_20, %c0_21], %25 {strides = array<i32>} : memref<8x128xf32, #tpu.memory_space<vmem>>, vector<8x128xf32>,
    } else {
    }
    return
  }
  func.func @transform_0(%arg0: i32, %arg1: i32) -> (i32, i32) {
    %c0_i32 = arith.constant 0 : i32
    return %arg0, %arg1 : i32, i32
  }
  func.func @transform_1(%arg0: i32, %arg1: i32) -> (i32, i32) {
    %c0_i32 = arith.constant 0 : i32
    %c0_i32_0 = arith.constant 0 : i32
    return %arg1, %c0_i32 : i32, i32
  }
  func.func @transform_2(%arg0: i32, %arg1: i32) -> (i32, i32) {
    %c0_i32 = arith.constant 0 : i32
    %c0_i32_0 = arith.constant 0 : i32
    %c0_i32_1 = arith.constant 0 : i32
    return %c0_i32, %c0_i32_0 : i32, i32
  }
  func.func @transform_3(%arg0: i32, %arg1: i32) -> (i32, i32) {
    %c0_i32 = arith.constant 0 : i32
    %c0_i32_0 = arith.constant 0 : i32
    %c0_i32_1 = arith.constant 0 : i32
    return %c0_i32, %c0_i32_0 : i32, i32
  }
  func.func @transform_4(%arg0: i32, %arg1: i32) -> (i32, i32) {
    %c0_i32 = arith.constant 0 : i32
    %c0_i32_0 = arith.constant 0 : i32
    %c0_i32_1 = arith.constant 0 : i32
    return %c0_i32, %c0_i32_0 : i32, i32
  }
  func.func @transform_5(%arg0: i32, %arg1: i32) -> (i32, i32) {
    %c0_i32 = arith.constant 0 : i32
    %c0_i32_0 = arith.constant 0 : i32
    return %arg0, %c0_i32 : i32, i32
  }
}

</mosaic_0001>

<bundles_post_ra>
// kernel: tpu_custom_call.1
= control target key start
LH: loop header
LB: loop body
LE: loop exit
PB: predicated region body
PF: predicated region fallthrough
CT: control target
= control target key end

     0   :  { %s5718_s0 = inlined_call_operand.hbm [shape: f32[8,1024], index: 0, kind: input, shape index: {}]   ;;  %s5719_s1 = inlined_call_operand.hbm [shape: f32[1024,128], index: 1, kind: input, shape index: {}]   ;;  %s5720_s2 = inlined_call_operand.vmem [shape: f32[1,128], index: 2, kind: input, shape index: {}]   ;;  %s5721_s3 = inlined_call_operand.hbm [shape: f32[128,128], index: 3, kind: input, shape index: {}]   ;;  %s5722_s4 = inlined_call_operand.vmem [shape: f32[1,128], index: 4, kind: input, shape index: {}]   ;;  %s5723_s5 = inlined_call_operand.hbm [shape: f32[8,128], index: 5, kind: output, shape index: {}]  }
   0x1   :  { %5862 = sst [smem:[#allocation43_spill]] %s5718_s0 }
   0x2   :  { %10 = vsyncpa [#allocation4], 0 }
   0x3   :  { %12 = vsyncpa [#allocation4 + $0x1], 0 }
   0x4   :  { %13 = vsyncpa [#allocation7], 0 }
   0x5   :  { %15 = vsyncpa [#allocation7 + $0x1], 0 }
   0x6   :  { %16 = vsyncpa [#allocation5], 0  ;;  %s3943_s18 = smov 0   ;;  %s3945_s19 = smov 0  }
   0x7   :  { %s3947_s20 = smov 0   ;;  %s3949_s21 = smov 0  }
   0x8   :  { %s3951_s22 = smov 0   ;;  %s3953_s23 = smov 0  }
   0x9 LB: > { %s3972_s24 = sadd.s32 4294967295, %s3902_s23   ;;  %p56_p0 = scmp.ne.s32.totalorder %s3886_s19, %s3882_s18  ;;  %s3902_s23 = sphi %s3953_s23, %s22_s23   ;;  %s3898_s22 = sphi %s3951_s22, %s6087_s22   ;;  %s3894_s21 = sphi %s3949_s21, %s6086_s21   ;;  %s3890_s20 = sphi %s3947_s20, %s6085_s20   ;;  %s3886_s19 = sphi %s3945_s19, %s6084_s19   ;;  %s3882_s18 = sphi %s3943_s18, %s6083_s18  }
   0xa   : > { %p57_p1 = scmp.eq.s32.totalorder %s3972_s24, 0  ;;  %p2893_p2 = scmp.ge.s32.totalorder %s3902_s23, 1 }
   0xb   : > { %p182_p3 = scmp.lt.s32.totalorder %s3902_s23, 3  ;;  %s3904_s27 = smov [#allocation8]  }
   0xc   : > { %p3980_p4 = por %p57_p1, %p56_p0  ;;  %s197_s28 = sshll.u32 %s3904_s27, 4  ;;  %s198_s28 = int_to_ptr.vmem [resolvable:$true] %s197_s28 }
   0xd   : > { %p3984_p5 = pnand %p2893_p2, %p182_p3  ;;  %s31_s30 = sadd.s32 1, %s3898_s22 }
   0xe   : > { %s3745_s6 = scalar_lea.vmem %s198_s28, 2048  ;;  %p3753_p12 = scmp.lt.s32.totalorder %s198_s28, %s198_s28 }
   0xf   : > { %p3661_p6 = pneg %p3984_p5  ;;  %p3746_p9 = scmp.ne.s32.totalorder %s198_s28, %s3745_s6 }
  0x10   : > { %p3754_p13 = scmp.lt.s32.totalorder %s3745_s6, %s3745_s6 }
  0x11   : > { %p3992_p7 = pnand %p3661_p6, %p57_p1 }
  0x12   : > { %p3755_p0 = por %p3754_p13, %p3753_p12 }
  0x13   : > { %p3736_p8 = pneg %p3992_p7 }
  0x15   : > { %p3748_p10 = pnand %p3746_p9, %p3736_p8 }
  0x17   : > { %p3749_p11 = pneg %p3748_p10 }
  0x19   : > { %p3756_p2 = pnand %p3755_p0, %p3749_p11 }
  0x1b   : > { %3759 = shalt.err (!%p3756_p2)
}
  0x1c   : > { %s5724_s7 = smov 128   ;;  %s5725_s8 = smov 8  }
  0x1d   : > { %3664 = dma.hbm_to_vmem [thread:$0]  (!%p3992_p7), %s5721_s3, 2048, %s198_s28, [#allocation7], %s5724_s7, %s5724_s7, %s5725_s8  }
  0x1e   : > { %p32_p3 = scmp.ge.s32.totalorder %s31_s30, 2  ;;  %s43_s11 = sadd.s32 1, %s3890_s20 }
  0x1f   : > { %p50_p6 = scmp.ne.s32.totalorder %s3890_s20, %s3886_s19  ;;  %p51_p8 = scmp.eq.s32.totalorder %s3902_s23, 0 }
  0x20   : > { %s6089_s30 = smov (%p32_p3, %s31_s30), 0  ;;  %p3673_p10 = scmp.lt.s32.totalorder %s3902_s23, 2 }
  0x21   : > { %p52_p9 = por %p51_p8, %p50_p6  ;;  %s39_s12 = ssub.s32 %s3898_s22, %s6089_s30 }
  0x22   : > { %s214_s13 = sand.u32 1, %s3890_s20   ;;  %p41_p11 = scmp.eq.s32.totalorder %s39_s12, 0 }
  0x23   : > { %s2896_s14 = sshll.u32 %s214_s13, 5  ;;  %s2915_s15 = sshll.u32 %s3898_s22, 9 }
  0x24   : > { %s4019_s16 = scalar_select %p41_p11, %s3890_s20, %s43_s11  }
  0x25   : > { %s5866_s0 = sld [smem:[#allocation43_spill]]  ;;  %s218_s28 = scalar_lea.vmem [#allocation3], %s2896_s14 }
  0x26   : > { %s228_s29 = sshll.u32 %s218_s28, 4  ;;  %p4024_p7 = pnand %p3673_p10, %p52_p9  ;;  %s229_s29 = int_to_ptr.vmem [resolvable:$true] %s228_s29 }
  0x27   : > { %s2899_s9 = sshll.u32 %s214_s13, 9  ;;  %s215_s10 = scalar_lea.sflag [#allocation4], %s214_s13 }
  0x28   : > { %p3762_p12 = pneg %p4024_p7  ;;  %s3773_s12 = scalar_lea.vmem %s229_s29, 512 }
  0x29   : > { %p3774_p13 = scmp.ne.s32.totalorder %s229_s29, %s3773_s12  ;;  %s3907_s11 = smov [#allocation3]  }
  0x2a   : > { %s3778_s14 = sshll.u32 %s3907_s11, 4  ;;  %s3779_s14 = int_to_ptr.vmem [resolvable:$false] %s3778_s14 }
  0x2b   : > { %s226_s27 = scalar_lea.hbm %s5866_s0, %s2915_s15  ;;  %p3776_p0 = pnand %p3774_p13, %p3762_p12 }
  0x2c   : > { %s3780_s15 = scalar_lea.vmem %s3779_s14, 1024  ;;  %p3781_p3 = scmp.lt.s32.totalorder %s229_s29, %s3779_s14 }
  0x2d   : > { %p3777_p2 = pneg %p3776_p0  ;;  %p3782_p6 = scmp.lt.s32.totalorder %s3780_s15, %s3773_s12 }
  0x2f   : > { %p3783_p8 = por %p3782_p6, %p3781_p3 }
  0x31   : > { %p3784_p9 = pnand %p3783_p8, %p3777_p2 }
  0x33   : > { %3787 = shalt.err (!%p3784_p9)
}
  0x34   : > { %3668 = dma.hbm_to_vmem [thread:$0]  (!%p4024_p7), %s226_s27, 512, %s229_s29, %s215_s10  }
  0x35   : > { %s2916_s13 = sshll.u32 %s3898_s22, 13  ;;  %s239_s17 = scalar_lea.vmem [#allocation6], %s2899_s9 }
  0x36   : > { %s246_s18 = sshll.u32 %s239_s17, 4  ;;  %s235_s28 = sand.u32 1, %s3902_s23   ;;  %s247_s18 = int_to_ptr.vmem [resolvable:$true] %s246_s18 }
  0x37   : > { %s245_s8 = scalar_lea.hbm %s5719_s1, %s2916_s13  ;;  %s236_s14 = scalar_lea.sflag [#allocation7], %s235_s28 }
  0x38   : > { %s3801_s12 = scalar_lea.vmem %s247_s18, 8192  ;;  %s3908_s15 = smov [#allocation6]  }
  0x39   : > { %p3802_p10 = scmp.ne.s32.totalorder %s247_s18, %s3801_s12  ;;  %s3806_s0 = sshll.u32 %s3908_s15, 4  ;;  %s3807_s0 = int_to_ptr.vmem [resolvable:$false] %s3806_s0 }
  0x3a   : > { %s3808_s27 = scalar_lea.vmem %s3807_s0, 16384  ;;  %p3809_p0 = scmp.lt.s32.totalorder %s247_s18, %s3807_s0 }
  0x3b   : > { %p3804_p11 = pnand %p3802_p10, %p3762_p12  ;;  %p3810_p2 = scmp.lt.s32.totalorder %s3808_s27, %s3801_s12 }
  0x3d   : > { %p3805_p13 = pneg %p3804_p11  ;;  %p3811_p3 = por %p3810_p2, %p3809_p0 }
  0x3f   : > { %p3812_p6 = pnand %p3811_p3, %p3805_p13 }
  0x41   : > { %3815 = shalt.err (!%p3812_p6)
}
  0x42   : > { %s5868_s7 = smov 8   ;;  %s5869_s29 = smov 128  }
  0x43   : > { %3671 = dma.hbm_to_vmem [thread:$0]  (!%p4024_p7), %s245_s8, 8192, %s247_s18, %s236_s14, %s5869_s29, %s5869_s29, %s5868_s7  }
  0x44   : > { %258 = sbr.rel (%p3984_p5) target bundleno = 836 (0x344), region = 40 }
  0x49   : > { %s260_s9 = sand.u32 1, %s3886_s19  }
  0x4a   : > { %s2903_s10 = sshll.u32 %s260_s9, 5  ;;  %s261_s13 = scalar_lea.sflag [#allocation4], %s260_s9 }
  0x4b   : > { %s4051_s17 = scalar_lea.vmem [#allocation3], %s2903_s10 }
  0x4c   : > { %3865 = dma.done.wait (%p3980_p4), %s261_s13, 512  }
  0x4d   : > { %3867 = vsyncadd (%p3980_p4), %s261_s13, 4294966784  ;;  %s269_s0 = sand.u32 1, %s3972_s24   ;;  %s2904_s6 = sshll.u32 %s260_s9, 9 }
  0x4e   : > { %s270_s8 = scalar_lea.sflag [#allocation7], %s269_s0  ;;  %s4058_s18 = scalar_lea.vmem [#allocation6], %s2904_s6 }
  0x4f   : > { %3869 = dma.done.wait (%p3980_p4), %s270_s8, 8192  }
  0x50   : > { %3871 = vsyncadd (%p3980_p4), %s270_s8, 4294959104 }
  0x51   : > { %3873 = dma.done.wait (%p57_p1), [#allocation7], 2048  }
  0x52   : > { %3875 = vsyncadd (%p57_p1), [#allocation7], 4294965248  ;;  %p2906_p5 = scmp.ne.s32.totalorder %s3894_s21, 0 }
  0x54   : > { %309 = sbr.rel (%p2906_p5) target bundleno = 91 (0x5b), region = 56 }
  0x59   : > { %v3909_v0 = vmov 0.0  }
  0x5a   : > { %310 = vst [vmem:[#allocation2] sm:$0xff] %v3909_v0 }
  0x5b PF: > { %v347_v1 = vld [vmem:[%s4058_s18 + $0xf8] sm:$0xff]  ;;  %v346_v3 = vld [vmem:[%s4058_s18 + $0xf0] sm:$0xff]  ;;  %v345_v8 = vld [vmem:[%s4058_s18 + $0xe8] sm:$0xff]  ;;  %p2907_p1 = scmp.ne.s32.totalorder %s3894_s21, 1 }
  0x5c   : > { %v331_v2 = vld [vmem:[%s4058_s18 + $0x78] sm:$0xff]  ;;  %v4072_v4 = vand.u32 4294901760, %v347_v1  ;;  %v4076_v6 = vand.u32 4294901760, %v346_v3  ;;  %v330_v7 = vld [vmem:[%s4058_s18 + $0x70] sm:$0xff]  ;;  %v329_v9 = vld [vmem:[%s4058_s18 + $0x68] sm:$0xff]  ;;  %v4083_v11 = vand.u32 4294901760, %v345_v8 }
  0x5d   : > { %v4074_v5 = vand.u32 4294901760, %v331_v2  ;;  %v4081_v10 = vand.u32 4294901760, %v330_v7  ;;  %v4085_v12 = vand.u32 4294901760, %v329_v9  ;;  %v344_v13 = vld [vmem:[%s4058_s18 + $0xe0] sm:$0xff]  ;;  %v343_v15 = vld [vmem:[%s4058_s18 + $0xd8] sm:$0xff]  ;;  %v4104_v21 = vld [vmem:[%s4058_s18 + $0xd0] sm:$0xff] }
  0x5e   : > { %v328_v14 = vld [vmem:[%s4058_s18 + $0x60] sm:$0xff]  ;;  %2917 = vmatprep.subr.mxu0 %v4072_v4  ;;  %v4091_v16 = vand.u32 4294901760, %v344_v13  ;;  %v4095_v18 = vand.u32 4294901760, %v343_v15  ;;  %v4098_v19 = vsub.f32 %v347_v1, %v4072_v4  ;;  %v4101_v20 = vld [vmem:[%s4058_s18 + $0x58] sm:$0xff]  ;;  %v4107_v22 = vld [vmem:[%s4058_s18 + $0x50] sm:$0xff]  ;;  %v4117_v25 = vand.u32 4294901760, %v4104_v21 }
  0x5f   : > { %v4093_v17 = vand.u32 4294901760, %v328_v14  ;;  %2918 = vmatpush3.msra.mxu0 %v4074_v5  ;;  %v4111_v23 = vand.u32 4294901760, %v4101_v20  ;;  %v4114_v24 = vsub.f32 %v331_v2, %v4074_v5  ;;  %v4120_v26 = vsub.f32 %v346_v3, %v4076_v6  ;;  %v4123_v27 = vld [vmem:[%s4058_s18 + $0xc8] sm:$0xff]  ;;  %v4129_v29 = vld [vmem:[%s4058_s18 + $0xc0] sm:$0xff]  ;;  %v4177_v47 = vld [vmem:[%s4058_s18 + $0xb8] sm:$0xff] }
  0x60   : > { %5870 = vst [vmem:[#allocation14_spill] sm:$0xff] %v4117_v25  ;;  %v4126_v28 = vld [vmem:[%s4058_s18 + $0x48] sm:$0xff]  ;;  %2919 = vmatprep.subr.mxu0 %v4076_v6  ;;  %v5739_v30 = vand.u32 4294901760, %v4098_v19  ;;  %v4134_v31 = vand.u32 4294901760, %v4107_v22  ;;  %v4137_v32 = vsub.f32 %v330_v7, %v4081_v10  ;;  %v4140_v33 = vand.u32 4294901760, %v4123_v27  ;;  %v4152_v38 = vld [vmem:[%s4058_s18 + $0x40] sm:$0xff] }
  0x61   : > { %2920 = vmatpush3.msra.mxu0 %v4081_v10  ;;  %v5738_v34 = vand.u32 4294901760, %v4114_v24  ;;  %v5736_v35 = vand.u32 4294901760, %v4120_v26  ;;  %v4146_v36 = vsub.f32 %v345_v8, %v4083_v11  ;;  %v4149_v37 = vand.u32 4294901760, %v4126_v28  ;;  %v4188_v52 = vld [vmem:[%s4058_s18 + $0x38] sm:$0xff]  ;;  %v4196_v57 = vld [vmem:[%s4058_s18 + $0xb0] sm:$0xff]  ;;  %v4222_v3 = vld [vmem:[%s4058_s18 + $0xa8] sm:$0xff] }
  0x62   : > { %5871 = vst [vmem:[#allocation15_spill] sm:$0xff] %v4134_v31  ;;  %5872 = vst [vmem:[#allocation16_spill] sm:$0xff] %v4140_v33  ;;  %2921 = vmatprep.subr.mxu0 %v4083_v11  ;;  %v608_v39 = vsub.f32 %v4098_v19, %v5739_v30  ;;  %v5735_v40 = vand.u32 4294901760, %v4137_v32  ;;  %v4160_v41 = vsub.f32 %v329_v9, %v4085_v12  ;;  %v4163_v42 = vand.u32 4294901760, %v4129_v29  ;;  %v4209_v62 = vld [vmem:[%s4058_s18 + $0x30] sm:$0xff] }
  0x63   : > { %5873 = vst [vmem:[#allocation17_spill] sm:$0xff] %v4149_v37  ;;  %2922 = vmatpush3.msra.mxu0 %v4085_v12  ;;  %v496_v43 = vsub.f32 %v4114_v24, %v5738_v34  ;;  %v615_v44 = vsub.f32 %v4120_v26, %v5736_v35  ;;  %v5732_v45 = vand.u32 4294901760, %v4146_v36  ;;  %v4174_v46 = vsub.f32 %v344_v13, %v4091_v16  ;;  %v4330_v35 = vld [vmem:[%s4058_s18 + $0x10] sm:$0xff]  ;;  %v4342_v34 = vld [vmem:[%s4058_s18 + $0x88] sm:$0xff] }
  0x64   : > { %5874 = vst [vmem:[#allocation18_spill] sm:$0xff] %v4163_v42  ;;  %2923 = vmatprep.subr.mxu0 %v4091_v16  ;;  %v609_v48 = vand.u32 4294901760, %v608_v39  ;;  %v503_v49 = vsub.f32 %v4137_v32, %v5735_v40  ;;  %v5731_v50 = vand.u32 4294901760, %v4160_v41  ;;  %v4185_v51 = vand.u32 4294901760, %v4152_v38 }
  0x65   : > { %2924 = vmatpush3.msra.mxu0 %v4093_v17  ;;  %v497_v53 = vand.u32 4294901760, %v496_v43  ;;  %v616_v54 = vand.u32 4294901760, %v615_v44  ;;  %v622_v55 = vsub.f32 %v4146_v36, %v5732_v45  ;;  %v5729_v56 = vand.u32 4294901760, %v4174_v46 }
  0x66   : > { %5875 = vst [vmem:[#allocation19_spill] sm:$0xff] %v4185_v51  ;;  %2925 = vmatprep.subr.mxu0 %v4095_v18  ;;  %2952 = vmatprep.subr.mxu1 %v609_v48  ;;  %v504_v58 = vand.u32 4294901760, %v503_v49  ;;  %v510_v59 = vsub.f32 %v4160_v41, %v5731_v50  ;;  %v4203_v60 = vsub.f32 %v328_v14, %v4093_v17  ;;  %v4206_v61 = vand.u32 4294901760, %v4177_v47  ;;  %v4234_v14 = vld [vmem:[%s4058_s18 + $0x28] sm:$0xff]  ;;  %v4305_v50 = vld [vmem:[%s4058_s18 + $0x18] sm:$0xff] }
  0x67   : > { %2926 = vmatpush3.msra.mxu0 %v4111_v23  ;;  %2953 = vmatpush3.msra.mxu1 %v497_v53  ;;  %v623_v63 = vand.u32 4294901760, %v622_v55  ;;  %v629_v0 = vsub.f32 %v4174_v46, %v5729_v56  ;;  %v4216_v1 = vsub.f32 %v343_v15, %v4095_v18  ;;  %v4219_v2 = vand.u32 4294901760, %v4188_v52  ;;  %v4258_v53 = vld [vmem:[%s4058_s18 + $0xa0] sm:$0xff] }
  0x68   : > { %5876 = vst [vmem:[#allocation20_spill] sm:$0xff] %v4206_v61  ;;  %2927 = vmatprep.subr.mxu0 %v4117_v25  ;;  %2954 = vmatprep.subr.mxu1 %v616_v54  ;;  %v511_v7 = vand.u32 4294901760, %v510_v59  ;;  %v5728_v8 = vand.u32 4294901760, %v4203_v60  ;;  %v4228_v9 = vsub.f32 %v4101_v20, %v4111_v23  ;;  %v4231_v13 = vand.u32 4294901760, %v4196_v57 }
  0x69   : > { %5877 = vst [vmem:[#allocation21_spill] sm:$0xff] %v4219_v2  ;;  %2928 = vmatpush3.msra.mxu0 %v4134_v31  ;;  %2955 = vmatpush3.msra.mxu1 %v504_v58  ;;  %v630_v15 = vand.u32 4294901760, %v629_v0  ;;  %v5726_v39 = vand.u32 4294901760, %v4216_v1  ;;  %v4240_v43 = vsub.f32 %v4104_v21, %v4117_v25  ;;  %v4243_v44 = vand.u32 4294901760, %v4209_v62 }
  0x6a   : > { %5878 = vst [vmem:[#allocation22_spill] sm:$0xff] %v4231_v13  ;;  %2929 = vmatprep.subr.mxu0 %v4140_v33  ;;  %2956 = vmatprep.subr.mxu1 %v623_v63  ;;  %v517_v20 = vsub.f32 %v4203_v60, %v5728_v8  ;;  %v5727_v48 = vand.u32 4294901760, %v4228_v9  ;;  %v4252_v49 = vsub.f32 %v4107_v22, %v4134_v31  ;;  %v4255_v21 = vand.u32 4294901760, %v4222_v3  ;;  %v4293_v8 = vld [vmem:[%s4058_s18 + $0x98] sm:$0xff] }
  0x6b   : > { %5879 = vst [vmem:[#allocation23_spill] sm:$0xff] %v4243_v44  ;;  %2930 = vmatpush3.msra.mxu0 %v4149_v37  ;;  %2957 = vmatpush3.msra.mxu1 %v511_v7  ;;  %v636_v54 = vsub.f32 %v4216_v1, %v5726_v39  ;;  %v5730_v55 = vand.u32 4294901760, %v4240_v43  ;;  %v4267_v58 = vsub.f32 %v4123_v27, %v4140_v33  ;;  %v4270_v22 = vand.u32 4294901760, %v4234_v14  ;;  %v4282_v27 = vld [vmem:[%s4058_s18 + $0x20] sm:$0xff] }
  0x6c   : > { %5880 = vst [vmem:[#allocation24_spill] sm:$0xff] %v4255_v21  ;;  %2931 = vmatprep.subr.mxu0 %v4163_v42  ;;  %2958 = vmatprep.subr.mxu1 %v630_v15  ;;  %v518_v59 = vand.u32 4294901760, %v517_v20  ;;  %v524_v63 = vsub.f32 %v4228_v9, %v5727_v48  ;;  %v5733_v0 = vand.u32 4294901760, %v4252_v49  ;;  %v4279_v7 = vsub.f32 %v4126_v28, %v4149_v37  ;;  %v313_v37 = vld [vmem:[%s4051_s17 + $0x8] sm:$0xff] }
  0x6d   : > { %5881 = vst [vmem:[#allocation25_spill] sm:$0xff] %v4270_v22  ;;  %2932 = vmatpush3.msra.mxu0 %v4185_v51  ;;  %v637_v39 = vand.u32 4294901760, %v636_v54  ;;  %v643_v15 = vsub.f32 %v4240_v43, %v5730_v55  ;;  %v5734_v20 = vand.u32 4294901760, %v4267_v58  ;;  %v4290_v48 = vand.u32 4294901760, %v4258_v53 }
  0x6e   : > { %2959 = vmatpush3.msra.mxu1 %v518_v59  ;;  %2933 = vmatprep.subr.mxu0 %v4206_v61  ;;  %v525_v28 = vand.u32 4294901760, %v524_v63  ;;  %v531_v54 = vsub.f32 %v4252_v49, %v5733_v0  ;;  %v5737_v56 = vand.u32 4294901760, %v4279_v7  ;;  %v4302_v55 = vsub.f32 %v4129_v29, %v4163_v42  ;;  %v4319_v29 = vld [vmem:[%s4058_s18 + $0x90] sm:$0xff] }
  0x6f   : > { %5882 = vst [vmem:[#allocation26_spill] sm:$0xff] %v4290_v48  ;;  %2960 = vmatprep.subr.mxu1 %v637_v39  ;;  %2934 = vmatpush3.msra.mxu0 %v4219_v2  ;;  %v644_v59 = vand.u32 4294901760, %v643_v15  ;;  %v650_v63 = vsub.f32 %v4267_v58, %v5734_v20  ;;  %v4312_v45 = vand.u32 4294901760, %v4282_v27  ;;  %v4316_v0 = vsub.f32 %v4152_v38, %v4185_v51 }
  0x70   : > { %2961 = vmatpush3.msra.mxu1 %v525_v28  ;;  %2935 = vmatprep.subr.mxu0 %v4231_v13  ;;  %v532_v39 = vand.u32 4294901760, %v531_v54  ;;  %v538_v15 = vsub.f32 %v4279_v7, %v5737_v56  ;;  %v5740_v20 = vand.u32 4294901760, %v4302_v55  ;;  %v4327_v40 = vand.u32 4294901760, %v4293_v8 }
  0x71   : > { %5883 = vst [vmem:[#allocation27_spill] sm:$0xff] %v4312_v45  ;;  %2962 = vmatprep.subr.mxu1 %v644_v59  ;;  %2936 = vmatpush3.msra.mxu0 %v4243_v44  ;;  %v651_v38 = vand.u32 4294901760, %v650_v63  ;;  %v5745_v28 = vand.u32 4294901760, %v4316_v0  ;;  %v4336_v54 = vsub.f32 %v4177_v47, %v4206_v61  ;;  %v4339_v56 = vand.u32 4294901760, %v4305_v50 }
  0x72   : > { %2963 = vmatpush3.msra.mxu1 %v532_v39  ;;  %2937 = vmatprep.subr.mxu0 %v4255_v21  ;;  %v539_v30 = vand.u32 4294901760, %v538_v15  ;;  %v657_v59 = vsub.f32 %v4302_v55, %v5740_v20  ;;  %v4350_v63 = vsub.f32 %v4188_v52, %v4219_v2  ;;  %v4353_v47 = vand.u32 4294901760, %v4319_v29  ;;  %v4368_v52 = vld [vmem:[%s4058_s18 + $0x8] sm:$0xff] }
  0x73   : > { %5884 = vst [vmem:[#allocation28_spill] sm:$0xff] %v4339_v56  ;;  %2964 = vmatprep.subr.mxu1 %v651_v38  ;;  %2938 = vmatpush3.msra.mxu0 %v4270_v22  ;;  %v545_v39 = vsub.f32 %v4316_v0, %v5745_v28  ;;  %v4362_v20 = vsub.f32 %v4196_v57, %v4231_v13  ;;  %v4365_v61 = vand.u32 4294901760, %v4330_v35  ;;  %v4377_v15 = vand.u32 4294901760, %v4342_v34  ;;  %v4380_v57 = vld [vmem:[%s4058_s18 + $0x80] sm:$0xff] }
  0x74   : > { %5885 = vst [vmem:[#allocation29_spill] sm:$0xff] %v4353_v47  ;;  %2965 = vmatpush3.msra.mxu1 %v539_v30  ;;  %2939 = vmatprep.subr.mxu0 %v4290_v48  ;;  %v658_v38 = vand.u32 4294901760, %v657_v59  ;;  %v4374_v28 = vsub.f32 %v4209_v62, %v4243_v44  ;;  %v5888_v30 = vand.u32 4294901760, %v4336_v54  ;;  %v4389_v2 = vsub.f32 %v4222_v3, %v4255_v21  ;;  %v4404_v59 = vld [vmem:[%s4058_s18] sm:$0xff] }
  0x75   : > { %5886 = vst [vmem:[#allocation30_spill] sm:$0xff] %v4365_v61  ;;  %5887 = vst [vmem:[#allocation31_spill] sm:$0xff] %v4377_v15  ;;  %2940 = vmatpush3.msra.mxu0 %v4312_v45  ;;  %v546_v13 = vand.u32 4294901760, %v545_v39  ;;  %v5890_v62 = vand.u32 4294901760, %v4350_v63  ;;  %v4397_v42 = vand.u32 4294901760, %v4368_v52  ;;  %v4412_v21 = vand.u32 4294901760, %v4380_v57 }
  0x76   : > { %v664_v51 = vsub.f32 %v4336_v54, %v5888_v30  ;;  %5889 = vst [vmem:[#allocation32_spill] sm:$0xff] %v4389_v2  ;;  %2966 = vmatprep.subr.mxu1 %v658_v38  ;;  %2941 = vmatprep.subr.mxu0 %v4327_v40  ;;  %v4401_v30 = vsub.f32 %v4234_v14, %v4270_v22  ;;  %v5891_v38 = vand.u32 4294901760, %v4362_v20  ;;  %v5892_v14 = vand.u32 4294901760, %v4374_v28 }
  0x77   : > { %v552_v44 = vsub.f32 %v4350_v63, %v5890_v62  ;;  %2967 = vmatpush3.msra.mxu1 %v546_v13  ;;  %2942 = vmatpush3.msra.mxu0 %v4339_v56  ;;  %v4422_v22 = vsub.f32 %v4258_v53, %v4290_v48  ;;  %v5893_v31 = vand.u32 4294901760, %v4389_v2  ;;  %v4430_v25 = vand.u32 4294901760, %v4404_v59 }
  0x78   : > { %v665_v3 = vand.u32 4294901760, %v664_v51  ;;  %v671_v62 = vsub.f32 %v4362_v20, %v5891_v38  ;;  %2943 = vmatprep.subr.mxu0 %v4353_v47  ;;  %v559_v13 = vsub.f32 %v4374_v28, %v5892_v14  ;;  %v312_v38 = vld [vmem:[%s4051_s17] sm:$0xff]  ;;  %v4434_v14 = vsub.f32 %v4282_v27, %v4312_v45 }
  0x79   : > { %v553_v33 = vand.u32 4294901760, %v552_v44  ;;  %2944 = vmatpush3.msra.mxu0 %v4365_v61  ;;  %v678_v44 = vsub.f32 %v4389_v2, %v5893_v31  ;;  %v5894_v53 = vand.u32 4294901760, %v4401_v30  ;;  %v4441_v48 = vand.u32 4294901760, %v313_v37 }
  0x7a   : > { %2968 = vmatprep.subr.mxu1 %v665_v3  ;;  %v672_v39 = vand.u32 4294901760, %v671_v62  ;;  %v560_v51 = vand.u32 4294901760, %v559_v13  ;;  %2945 = vmatprep.subr.mxu0 %v4377_v15  ;;  %v5770_v62 = vand.u32 4294901760, %v4422_v22  ;;  %v5771_v2 = vand.u32 4294901760, %v4434_v14 }
  0x7b   : > { %2969 = vmatpush3.msra.mxu1 %v553_v33  ;;  %v566_v3 = vsub.f32 %v4401_v30, %v5894_v53  ;;  %5895 = vst [vmem:[#allocation33_spill] sm:$0xff] %v4441_v48  ;;  %v679_v31 = vand.u32 4294901760, %v678_v44  ;;  %2946 = vmatpush3.msra.mxu0 %v4397_v42  ;;  %v4447_v33 = vsub.f32 %v4293_v8, %v4327_v40  ;;  %v4449_v27 = vand.u32 4294901760, %v312_v38 }
  0x7c   : > { %2970 = vmatprep.subr.mxu1 %v672_v39  ;;  %2947 = vmatprep.subr.mxu0 %v4412_v21  ;;  %v685_v53 = vsub.f32 %v4422_v22, %v5770_v62  ;;  %v4456_v39 = vsub.f32 %v313_v37, %v4441_v48  ;;  %v4460_v44 = vsub.f32 %v4305_v50, %v4339_v56 }
  0x7d   : > { %5896 = vst [vmem:[#allocation34_spill] sm:$0xff] %v4449_v27  ;;  %2971 = vmatpush3.msra.mxu1 %v560_v51  ;;  %v567_v13 = vand.u32 4294901760, %v566_v3  ;;  %2948 = vmatpush3.msra.mxu0 %v4430_v25  ;;  %v573_v8 = vsub.f32 %v4434_v14, %v5771_v2  ;;  %v4468_v3 = vsub.f32 %v312_v38, %v4449_v27  ;;  %v5897_v38 = vand.u32 4294901760, %v4447_v33 }
  0x7e   : > { %2972 = vmatprep.subr.mxu1 %v679_v31  ;;  %v4472_v37 = vsub.f32 %v4319_v29, %v4353_v47  ;;  %v686_v62 = vand.u32 4294901760, %v685_v53  ;;  %v5776_v50 = vand.u32 4294901760, %v4456_v39  ;;  %2987 = vmatprep.subr.mxu0 %v4098_v19  ;;  %v5779_v31 = vand.u32 4294901760, %v4460_v44 }
  0x7f   : > { %2973 = vmatpush3.msra.mxu1 %v567_v13  ;;  %v4479_v2 = vsub.f32 %v4330_v35, %v4365_v61  ;;  %v574_v51 = vand.u32 4294901760, %v573_v8  ;;  %v692_v56 = vsub.f32 %v4447_v33, %v5897_v38  ;;  %717 = vmatprep.mubr.f32.mxu1 %v4441_v48  ;;  %v4496_v38 = vsub.f32 %v4342_v34, %v4377_v15 }
  0x80   : > { %2974 = vmatprep.subr.mxu1 %v686_v62  ;;  %v479_v53 = vsub.f32 %v4456_v39, %v5776_v50  ;;  %v580_v35 = vsub.f32 %v4460_v44, %v5779_v31  ;;  %v5898_v13 = vand.u32 4294901760, %v4468_v3  ;;  %v5899_v48 = vand.u32 4294901760, %v4472_v37 }
  0x81   : > { %2975 = vmatpush3.msra.mxu1 %v574_v51  ;;  %v693_v29 = vand.u32 4294901760, %v692_v56  ;;  %v4506_v61 = vsub.f32 %v4368_v52, %v4397_v42  ;;  %v5901_v47 = vand.u32 4294901760, %v4479_v2  ;;  %v5787_v56 = vand.u32 4294901760, %v4496_v38 }
  0x82   : > { %v485_v62 = vsub.f32 %v4468_v3, %v5898_v13  ;;  %v699_v50 = vsub.f32 %v4472_v37, %v5899_v48  ;;  %v480_v31 = vand.u32 4294901760, %v479_v53  ;;  %v581_v8 = vand.u32 4294901760, %v580_v35 }
  0x83   : > { %5900 = vst [vmem:[#allocation35_spill] sm:$0xff] %v4506_v61  ;;  %v587_v34 = vsub.f32 %v4479_v2, %v5901_v47  ;;  %2976 = vmatprep.subr.mxu1 %v693_v29  ;;  %v5786_v13 = vand.u32 4294901760, %v4506_v61  ;;  %v4515_v48 = vsub.f32 %v4380_v57, %v4412_v21  ;;  %v706_v53 = vsub.f32 %v4496_v38, %v5787_v56 }
  0x84   : > { %v486_v51 = vand.u32 4294901760, %v485_v62  ;;  %v700_v15 = vand.u32 4294901760, %v699_v50  ;;  %481 = vmatprep.mubr.f32.mxu0 %v480_v31  ;;  %2977 = vmatpush3.msra.mxu1 %v581_v8  ;;  %v4522_v47 = vsub.f32 %v4404_v59, %v4430_v25  ;;  %v5918_v56 = vand.u32 4294901760, %v4098_v19 }
  0x85   : > { %5902 = vst [vmem:[#allocation36_spill] sm:$0xff] %v4515_v48  ;;  %v588_v52 = vand.u32 4294901760, %v587_v34  ;;  %v594_v50 = vsub.f32 %v4506_v61, %v5786_v13  ;;  %v5785_v57 = vand.u32 4294901760, %v4515_v48  ;;  %v707_v31 = vand.u32 4294901760, %v706_v53  ;;  %v5904_v34 = vld [vmem:[#allocation14_spill] sm:$0xff]  ;;  %v5907_v53 = vld [vmem:[#allocation16_spill] sm:$0xff] }
  0x86   : > { %5903 = vst [vmem:[#allocation37_spill] sm:$0xff] %v4522_v47  ;;  %487 = vmatmul.mubr.f32.vlgmr.msra.gmra.mxu0 %v486_v51  ;;  %2978 = vmatprep.subr.mxu1 %v700_v15  ;;  %v5784_v29 = vand.u32 4294901760, %v4522_v47  ;;  %v5905_v51 = vld [vmem:[#allocation15_spill] sm:$0xff]  ;;  %v5917_v13 = vld [vmem:[#allocation26_spill] sm:$0xff]  ;;  %v5926_v19 = vand.u32 4294901760, %v4146_v36 }
  0x87   : > { %2988 = vmatpush3.msra.mxu0 %v4114_v24  ;;  %2979 = vmatpush3.msra.mxu1 %v588_v52  ;;  %v595_v35 = vand.u32 4294901760, %v594_v50  ;;  %v713_v59 = vsub.f32 %v4515_v48, %v5785_v57  ;;  %v5906_v52 = vld [vmem:[#allocation32_spill] sm:$0xff]  ;;  %v5908_v50 = vld [vmem:[#allocation17_spill] sm:$0xff] }
  0x88   : > { %2989 = vmatprep.subr.mxu0 %v4120_v26  ;;  %854 = vmatprep.mubr.f32.mxu0 %v4456_v39  ;;  %v601_v15 = vsub.f32 %v4522_v47, %v5784_v29  ;;  %v5915_v29 = vld [vmem:[#allocation24_spill] sm:$0xff]  ;;  %v5916_v57 = vld [vmem:[#allocation25_spill] sm:$0xff] }
  0x89   : > { %2990 = vmatpush3.msra.mxu0 %v4137_v32  ;;  %2980 = vmatprep.subr.mxu1 %v707_v31  ;;  %v714_v8 = vand.u32 4294901760, %v713_v59  ;;  %v5909_v31 = vld [vmem:[#allocation18_spill] sm:$0xff]  ;;  %v5911_v59 = vld [vmem:[#allocation20_spill] sm:$0xff] }
  0x8a   : > { %2991 = vmatprep.subr.mxu0 %v4146_v36  ;;  %2981 = vmatpush3.msra.mxu1 %v595_v35  ;;  %v602_v62 = vand.u32 4294901760, %v601_v15  ;;  %v5910_v35 = vld [vmem:[#allocation19_spill] sm:$0xff]  ;;  %v5912_v15 = vld [vmem:[#allocation21_spill] sm:$0xff]  ;;  %v5931_v36 = vand.u32 4294901760, %v4468_v3 }
  0x8b   : > { %2992 = vmatpush3.msra.mxu0 %v4160_v41  ;;  %2982 = vmatprep.subr.mxu1 %v714_v8  ;;  %v5913_v8 = vld [vmem:[#allocation22_spill] sm:$0xff] }
  0x8c   : > { %2993 = vmatprep.subr.mxu0 %v4174_v46  ;;  %2983 = vmatpush3.msra.mxu1 %v602_v62  ;;  %v5914_v62 = vld [vmem:[#allocation23_spill] sm:$0xff] }
  0x8d   : > { %2994 = vmatpush3.msra.mxu0 %v4203_v60  ;;  %719 = vmatmul.mubr.f32.vlgmr.msra.gmra.mxu1 %v4449_v27  ;;  %v5919_v27 = vld [vmem:[#allocation28_spill] sm:$0xff] }
  0x8e   : > { %2995 = vmatprep.subr.mxu0 %v4216_v1  ;;  %3022 = vmatprep.subr.mxu1 %v4072_v4 }
  0x8f   : > { %2996 = vmatpush3.msra.mxu0 %v4228_v9  ;;  %3023 = vmatpush3.msra.mxu1 %v4074_v5 }
  0x90   : > { %2997 = vmatprep.subr.mxu0 %v4240_v43  ;;  %3024 = vmatprep.subr.mxu1 %v4076_v6 }
  0x91   : > { %2998 = vmatpush3.msra.mxu0 %v4252_v49  ;;  %3025 = vmatpush3.msra.mxu1 %v4081_v10 }
  0x92   : > { %2999 = vmatprep.subr.mxu0 %v4267_v58  ;;  %3026 = vmatprep.subr.mxu1 %v4083_v11 }
  0x93   : > { %3000 = vmatpush3.msra.mxu0 %v4279_v7  ;;  %3027 = vmatpush3.msra.mxu1 %v4085_v12 }
  0x94   : > { %3001 = vmatprep.subr.mxu0 %v4302_v55  ;;  %3028 = vmatprep.subr.mxu1 %v4091_v16 }
  0x95   : > { %3002 = vmatpush3.msra.mxu0 %v4316_v0  ;;  %3029 = vmatpush3.msra.mxu1 %v4093_v17 }
  0x96   : > { %3003 = vmatprep.subr.mxu0 %v4336_v54  ;;  %3030 = vmatprep.subr.mxu1 %v4095_v18 }
  0x97   : > { %3004 = vmatpush3.msra.mxu0 %v4350_v63  ;;  %3031 = vmatpush3.msra.mxu1 %v4111_v23 }
  0x98   : > { %3005 = vmatprep.subr.mxu0 %v4362_v20  ;;  %3032 = vmatprep.subr.mxu1 %v5904_v34 }
  0x99   : > { %3006 = vmatpush3.msra.mxu0 %v4374_v28  ;;  %3033 = vmatpush3.msra.mxu1 %v5905_v51 }
  0x9a   : > { %3007 = vmatprep.subr.mxu0 %v5906_v52  ;;  %3034 = vmatprep.subr.mxu1 %v5907_v53 }
  0x9b   : > { %3008 = vmatpush3.msra.mxu0 %v4401_v30  ;;  %3035 = vmatpush3.msra.mxu1 %v5908_v50 }
  0x9c   : > { %3009 = vmatprep.subr.mxu0 %v4422_v22  ;;  %3036 = vmatprep.subr.mxu1 %v5909_v31 }
  0x9d   : > { %3010 = vmatpush3.msra.mxu0 %v4434_v14  ;;  %3037 = vmatpush3.msra.mxu1 %v5910_v35 }
  0x9e   : > { %3011 = vmatprep.subr.mxu0 %v4447_v33  ;;  %3038 = vmatprep.subr.mxu1 %v5911_v59 }
  0x9f   : > { %3012 = vmatpush3.msra.mxu0 %v4460_v44  ;;  %3039 = vmatpush3.msra.mxu1 %v5912_v15 }
  0xa0   : > { %3013 = vmatprep.subr.mxu0 %v4472_v37  ;;  %3040 = vmatprep.subr.mxu1 %v5913_v8 }
  0xa1   : > { %3014 = vmatpush3.msra.mxu0 %v4479_v2  ;;  %3041 = vmatpush3.msra.mxu1 %v5914_v62 }
  0xa2   : > { %3015 = vmatprep.subr.mxu0 %v4496_v38  ;;  %3042 = vmatprep.subr.mxu1 %v5915_v29 }
  0xa3   : > { %3016 = vmatpush3.msra.mxu0 %v4506_v61  ;;  %3043 = vmatpush3.msra.mxu1 %v5916_v57  ;;  %v5920_v61 = vand.u32 4294901760, %v4114_v24  ;;  %v5921_v57 = vld [vmem:[#allocation29_spill] sm:$0xff]  ;;  %v5927_v24 = vand.u32 4294901760, %v4160_v41  ;;  %v5932_v41 = vand.u32 4294901760, %v4216_v1  ;;  %v5936_v1 = vand.u32 4294901760, %v4267_v58  ;;  %v361_v58 = vld [vmem:[%s4058_s18 + $0x168] sm:$0xff] }
  0xa4   : > { %3017 = vmatprep.subr.mxu0 %v4515_v48  ;;  %3044 = vmatprep.subr.mxu1 %v5917_v13  ;;  %v5922_v13 = vand.u32 4294901760, %v4120_v26  ;;  %v5925_v48 = vld [vmem:[#allocation31_spill] sm:$0xff]  ;;  %v5928_v26 = vand.u32 4294901760, %v4174_v46  ;;  %v5933_v46 = vand.u32 4294901760, %v4228_v9  ;;  %v5938_v9 = vand.u32 4294901760, %v4302_v55 }
  0xa5   : > { %3018 = vmatpush3.msra.mxu0 %v4522_v47  ;;  %3045 = vmatpush3.msra.mxu1 %v4312_v45  ;;  %v5923_v47 = vld [vmem:[#allocation30_spill] sm:$0xff]  ;;  %v5924_v45 = vand.u32 4294901760, %v4137_v32  ;;  %v5929_v32 = vand.u32 4294901760, %v4456_v39  ;;  %v378_v55 = vld [vmem:[%s4058_s18 + $0x1f0] sm:$0xff]  ;;  %v360_v39 = vld [vmem:[%s4058_s18 + $0x160] sm:$0xff] }
  0xa6   : > { %857 = vmatmul.mubr.f32.vlgmr.msra.gmra.mxu0 %v4468_v3  ;;  %3046 = vmatprep.subr.mxu1 %v4327_v40 }
  0xa7   : > { %3057 = vmatprep.subr.mxu0 %v5918_v56  ;;  %3047 = vmatpush3.msra.mxu1 %v5919_v27  ;;  %v5947_v56 = vand.u32 4294901760, %v4401_v30 }
  0xa8   : > { %3058 = vmatpush3.msra.mxu0 %v5920_v61  ;;  %3048 = vmatprep.subr.mxu1 %v5921_v57  ;;  %v5934_v61 = vand.u32 4294901760, %v4240_v43  ;;  %v5939_v43 = vand.u32 4294901760, %v4316_v0 }
  0xa9   : > { %3059 = vmatprep.subr.mxu0 %v5922_v13  ;;  %3049 = vmatpush3.msra.mxu1 %v5923_v47 }
  0xaa   : > { %3060 = vmatpush3.msra.mxu0 %v5924_v45  ;;  %3050 = vmatprep.subr.mxu1 %v5925_v48  ;;  %v5930_v45 = vand.u32 4294901760, %v4203_v60  ;;  %v5935_v60 = vand.u32 4294901760, %v4252_v49 }
  0xab   : > { %3061 = vmatprep.subr.mxu0 %v5926_v19  ;;  %3051 = vmatpush3.msra.mxu1 %v4397_v42  ;;  %v359_v19 = vld [vmem:[%s4058_s18 + $0x158] sm:$0xff] }
  0xac   : > { %3062 = vmatpush3.msra.mxu0 %v5927_v24  ;;  %3052 = vmatprep.subr.mxu1 %v4412_v21 }
  0xad   : > { %3063 = vmatprep.subr.mxu0 %v5928_v26  ;;  %3053 = vmatpush3.msra.mxu1 %v4430_v25  ;;  %v358_v26 = vld [vmem:[%s4058_s18 + $0x150] sm:$0xff] }
  0xae   : > { %961 = vmatprep.mubr.f32.mxu1 %v5929_v32  ;;  %3064 = vmatpush3.msra.mxu0 %v5930_v45  ;;  %v5952_v32 = vand.u32 4294901760, %v4460_v44  ;;  %v4732_v44 = vand.u32 4294901760, %v359_v19 }
  0xaf   : > { %965 = vmatmul.mubr.f32.vlgmr.msra.gmra.mxu1 %v5931_v36  ;;  %3065 = vmatprep.subr.mxu0 %v5932_v41 }
  0xb0   : > { %3092 = vmatprep.subr.mxu1 %v4072_v4  ;;  %3066 = vmatpush3.msra.mxu0 %v5933_v46  ;;  %v5937_v4 = vand.u32 4294901760, %v4279_v7  ;;  %v5942_v7 = vand.u32 4294901760, %v4362_v20  ;;  %5956 = vst [vmem:[#allocation18_spill] sm:$0xff] %v4732_v44 }
  0xb1   : > { %3093 = vmatpush3.msra.mxu1 %v4074_v5  ;;  %3067 = vmatprep.subr.mxu0 %v5934_v61  ;;  %v379_v5 = vld [vmem:[%s4058_s18 + $0x1f8] sm:$0xff] }
  0xb2   : > { %3094 = vmatprep.subr.mxu1 %v4076_v6  ;;  %3068 = vmatpush3.msra.mxu0 %v5935_v60  ;;  %v363_v6 = vld [vmem:[%s4058_s18 + $0x178] sm:$0xff]  ;;  %v4738_v60 = vand.u32 4294901760, %v358_v26 }
  0xb3   : > { %3095 = vmatpush3.msra.mxu1 %v4081_v10  ;;  %3069 = vmatprep.subr.mxu0 %v5936_v1  ;;  %v362_v10 = vld [vmem:[%s4058_s18 + $0x170] sm:$0xff]  ;;  %v4653_v49 = vand.u32 4294901760, %v363_v6 }
  0xb4   : > { %3096 = vmatprep.subr.mxu1 %v4083_v11  ;;  %3070 = vmatpush3.msra.mxu0 %v5937_v4  ;;  %v5940_v11 = vand.u32 4294901760, %v4336_v54  ;;  %v4660_v0 = vand.u32 4294901760, %v362_v10  ;;  %v4669_v54 = vand.u32 4294901760, %v378_v55  ;;  %5958 = vst [vmem:[#allocation19_spill] sm:$0xff] %v4738_v60 }
  0xb5   : > { %3097 = vmatpush3.msra.mxu1 %v4085_v12  ;;  %3071 = vmatprep.subr.mxu0 %v5938_v9  ;;  %v4651_v12 = vand.u32 4294901760, %v379_v5  ;;  %v4678_v20 = vsub.f32 %v363_v6, %v4653_v49  ;;  %v5961_v6 = vld [vmem:[#allocation35_spill] sm:$0xff] }
  0xb6   : > { %3098 = vmatprep.subr.mxu1 %v4091_v16  ;;  %3072 = vmatpush3.msra.mxu0 %v5939_v43  ;;  %v5941_v16 = vand.u32 4294901760, %v4350_v63  ;;  %v4671_v63 = vand.u32 4294901760, %v361_v58  ;;  %v4689_v13 = vsub.f32 %v362_v10, %v4660_v0  ;;  %v4706_v24 = vsub.f32 %v378_v55, %v4669_v54  ;;  %v5963_v10 = vld [vmem:[#allocation25_spill] sm:$0xff] }
  0xb7   : > { %3099 = vmatpush3.msra.mxu1 %v4093_v17  ;;  %3073 = vmatprep.subr.mxu0 %v5940_v11  ;;  %v377_v17 = vld [vmem:[%s4058_s18 + $0x1e8] sm:$0xff]  ;;  %v4683_v3 = vsub.f32 %v379_v5, %v4651_v12  ;;  %v5962_v9 = vand.u32 4294901760, %v5961_v6  ;;  %v5964_v11 = vld [vmem:[#allocation36_spill] sm:$0xff] }
  0xb8   : > { %3100 = vmatprep.subr.mxu1 %v4095_v18  ;;  %3074 = vmatpush3.msra.mxu0 %v5941_v16  ;;  %v5943_v18 = vand.u32 4294901760, %v4374_v28  ;;  %5944 = vst [vmem:[#allocation14_spill] sm:$0xff] %v4671_v63  ;;  %v4680_v28 = vand.u32 4294901760, %v377_v17  ;;  %v4701_v30 = vsub.f32 %v361_v58, %v4671_v63  ;;  %v5797_v36 = vand.u32 4294901760, %v4689_v13  ;;  %v373_v5 = vld [vmem:[%s4058_s18 + $0x1c8] sm:$0xff] }
  0xb9   : > { %3101 = vmatpush3.msra.mxu1 %v4111_v23  ;;  %3075 = vmatprep.subr.mxu0 %v5942_v7  ;;  %v5945_v23 = vand.u32 4294901760, %v5906_v52  ;;  %v4695_v52 = vand.u32 4294901760, %v360_v39  ;;  %v5798_v61 = vand.u32 4294901760, %v4706_v24  ;;  %v5965_v55 = vand.u32 4294901760, %v5964_v11  ;;  %v5966_v58 = vld [vmem:[#allocation26_spill] sm:$0xff]  ;;  %v372_v7 = vld [vmem:[%s4058_s18 + $0x1c0] sm:$0xff] }
  0xba   : > { %3102 = vmatprep.subr.mxu1 %v5904_v34  ;;  %3076 = vmatpush3.msra.mxu0 %v5943_v18  ;;  %5946 = vst [vmem:[#allocation15_spill] sm:$0xff] %v4680_v28  ;;  %v5948_v34 = vand.u32 4294901760, %v4422_v22  ;;  %v5951_v22 = vand.u32 4294901760, %v4447_v33  ;;  %v374_v33 = vld [vmem:[%s4058_s18 + $0x1d0] sm:$0xff]  ;;  %v5794_v1 = vand.u32 4294901760, %v4701_v30  ;;  %v4774_v16 = vsub.f32 %v359_v19, %v4732_v44  ;;  %v356_v18 = vld [vmem:[%s4058_s18 + $0x140] sm:$0xff] }
  0xbb   : > { %3103 = vmatpush3.msra.mxu1 %v5905_v51  ;;  %3077 = vmatprep.subr.mxu0 %v5945_v23  ;;  %v376_v51 = vld [vmem:[%s4058_s18 + $0x1e0] sm:$0xff]  ;;  %5949 = vst [vmem:[#allocation32_spill] sm:$0xff] %v4695_v52  ;;  %v4728_v41 = vsub.f32 %v360_v39, %v4695_v52  ;;  %v4755_v4 = vand.u32 4294901760, %v374_v33  ;;  %v4793_v19 = vsub.f32 %v358_v26, %v4738_v60 }
  0xbc   : > { %3104 = vmatprep.subr.mxu1 %v5907_v53  ;;  %3078 = vmatpush3.msra.mxu0 %v5947_v56  ;;  %v5950_v53 = vand.u32 4294901760, %v4434_v14  ;;  %v5799_v14 = vand.u32 4294901760, %v4678_v20  ;;  %v4720_v45 = vand.u32 4294901760, %v376_v51  ;;  %v5968_v56 = vld [vmem:[#allocation37_spill] sm:$0xff] }
  0xbd   : > { %3105 = vmatpush3.msra.mxu1 %v5908_v50  ;;  %3079 = vmatprep.subr.mxu0 %v5948_v34  ;;  %v375_v50 = vld [vmem:[%s4058_s18 + $0x1d8] sm:$0xff]  ;;  %5960 = vst [vmem:[#allocation20_spill] sm:$0xff] %v4755_v4  ;;  %v5796_v39 = vand.u32 4294901760, %v4728_v41  ;;  %v5969_v34 = vand.u32 4294901760, %v5968_v56  ;;  %v4812_v6 = vsub.f32 %v374_v33, %v4755_v4 }
  0xbe   : > { %3106 = vmatprep.subr.mxu1 %v5909_v31  ;;  %3080 = vmatpush3.msra.mxu0 %v5950_v53  ;;  %v5800_v31 = vand.u32 4294901760, %v4683_v3  ;;  %5953 = vst [vmem:[#allocation16_spill] sm:$0xff] %v4720_v45  ;;  %v4730_v46 = vand.u32 4294901760, %v375_v50  ;;  %v4768_v43 = vsub.f32 %v376_v51, %v4720_v45  ;;  %v5970_v51 = vld [vmem:[#allocation33_spill] sm:$0xff]  ;;  %v4790_v53 = vsub.f32 %v4706_v24, %v5798_v61  ;;  %v355_v56 = vld [vmem:[%s4058_s18 + $0x138] sm:$0xff] }
  0xbf   : > { %3107 = vmatpush3.msra.mxu1 %v5910_v35  ;;  %3081 = vmatprep.subr.mxu0 %v5951_v22  ;;  %v4715_v35 = vsub.f32 %v377_v17, %v4680_v28  ;;  %v4795_v22 = vand.u32 4294901760, %v373_v5 }
  0xc0   : > { %3108 = vmatprep.subr.mxu1 %v5911_v59  ;;  %3082 = vmatpush3.msra.mxu0 %v5952_v32  ;;  %v5954_v59 = vand.u32 4294901760, %v4472_v37  ;;  %5955 = vst [vmem:[#allocation17_spill] sm:$0xff] %v4730_v46  ;;  %v357_v37 = vld [vmem:[%s4058_s18 + $0x148] sm:$0xff]  ;;  %v4782_v23 = vsub.f32 %v375_v50, %v4730_v46  ;;  %v4800_v50 = vsub.f32 %v4701_v30, %v5794_v1  ;;  %v5972_v32 = vld [vmem:[#allocation27_spill] sm:$0xff]  ;;  %v5801_v11 = vand.u32 4294901760, %v4768_v43 }
  0xc1   : > { %3109 = vmatpush3.msra.mxu1 %v5912_v15  ;;  %v5957_v15 = vand.u32 4294901760, %v4479_v2  ;;  %v4748_v2 = vsub.f32 %v4683_v3, %v5800_v31  ;;  %v4776_v17 = vand.u32 4294901760, %v357_v37  ;;  %1131 = vmatprep.mubr.f32.mxu0 %v5970_v51  ;;  %5971 = vst [vmem:[#allocation22_spill] sm:$0xff] %v4795_v22  ;;  %v354_v1 = vld [vmem:[%s4058_s18 + $0x130] sm:$0xff]  ;;  %v353_v31 = vld [vmem:[%s4058_s18 + $0x128] sm:$0xff] }
  0xc2   : > { %3083 = vmatprep.subr.mxu0 %v5954_v59  ;;  %3110 = vmatprep.subr.mxu1 %v5913_v8  ;;  %v5959_v8 = vand.u32 4294901760, %v4496_v38  ;;  %v5795_v38 = vand.u32 4294901760, %v4715_v35  ;;  %v5973_v59 = vld [vmem:[#allocation34_spill] sm:$0xff] }
  0xc3   : > { %3084 = vmatpush3.msra.mxu0 %v5957_v15  ;;  %3111 = vmatpush3.msra.mxu1 %v5914_v62  ;;  %v4753_v62 = vsub.f32 %v4678_v20, %v5799_v14  ;;  %5967 = vst [vmem:[#allocation21_spill] sm:$0xff] %v4776_v17  ;;  %v4827_v33 = vsub.f32 %v357_v37, %v4776_v17  ;;  %v4853_v14 = vand.u32 4294901760, %v355_v56  ;;  %v4867_v37 = vand.u32 4294901760, %v354_v1  ;;  %v368_v15 = vld [vmem:[%s4058_s18 + $0x1a0] sm:$0xff] }
  0xc4   : > { %3085 = vmatprep.subr.mxu0 %v5959_v8  ;;  %3112 = vmatprep.subr.mxu1 %v5915_v29  ;;  %v4765_v29 = vsub.f32 %v4689_v13, %v5797_v36  ;;  %v4809_v26 = vsub.f32 %v4715_v35, %v5795_v38  ;;  %v4842_v38 = vld [vmem:[%s4058_s18 + $0x1b0] sm:$0xff]  ;;  %v4846_v36 = vsub.f32 %v373_v5, %v4795_v22  ;;  %v4898_v8 = vand.u32 4294901760, %v353_v31 }
  0xc5   : > { %3086 = vmatpush3.msra.mxu0 %v5962_v9  ;;  %3113 = vmatpush3.msra.mxu1 %v5963_v10  ;;  %v4817_v10 = vand.u32 4294901760, %v372_v7  ;;  %5976 = vst [vmem:[#allocation28_spill] sm:$0xff] %v4827_v33  ;;  %5978 = vst [vmem:[#allocation30_spill] sm:$0xff] %v4853_v14  ;;  %v352_v9 = vld [vmem:[%s4058_s18 + $0x120] sm:$0xff] }
  0xc6   : > { %3087 = vmatprep.subr.mxu0 %v5965_v55  ;;  %3114 = vmatprep.subr.mxu1 %v5966_v58  ;;  %v4820_v55 = vand.u32 4294901760, %v356_v18  ;;  %v371_v58 = vld [vmem:[%s4058_s18 + $0x1b8] sm:$0xff]  ;;  %5980 = vst [vmem:[#allocation35_spill] sm:$0xff] %v4867_v37  ;;  %5983 = vst [vmem:[#allocation26_spill] sm:$0xff] %v4898_v8 }
  0xc7   : > { %3088 = vmatpush3.msra.mxu0 %v5969_v34  ;;  %3115 = vmatpush3.msra.mxu1 %v5972_v32  ;;  %5974 = vst [vmem:[#allocation23_spill] sm:$0xff] %v4817_v10  ;;  %v5802_v34 = vand.u32 4294901760, %v4782_v23  ;;  %v5803_v32 = vand.u32 4294901760, %v4774_v16  ;;  %v4851_v61 = vand.u32 4294901760, %v371_v58 }
  0xc8   : > { %1133 = vmatmul.mubr.f32.vlgmr.msra.gmra.mxu0 %v5973_v59  ;;  %3116 = vmatprep.subr.mxu1 %v4327_v40  ;;  %5975 = vst [vmem:[#allocation24_spill] sm:$0xff] %v4820_v55  ;;  %v4832_v40 = vsub.f32 %v4728_v41, %v5796_v39  ;;  %v5804_v39 = vand.u32 4294901760, %v4793_v19  ;;  %v4865_v5 = vsub.f32 %v356_v18, %v4820_v55 }
  0xc9   : > { %3127 = vmatprep.subr.mxu0 %v4651_v12  ;;  %3117 = vmatpush3.msra.mxu1 %v5919_v27  ;;  %v1478_v27 = vand.u32 4294901760, %v4790_v53  ;;  %5977 = vst [vmem:[#allocation29_spill] sm:$0xff] %v4851_v61  ;;  %v5807_v53 = vand.u32 4294901760, %v4812_v6  ;;  %v4884_v18 = vsub.f32 %v4774_v16, %v5803_v32 }
  0xca   : > { %3128 = vmatpush3.msra.mxu0 %v4653_v49  ;;  %3118 = vmatprep.subr.mxu1 %v5921_v57  ;;  %5979 = vst [vmem:[#allocation31_spill] sm:$0xff] %v4865_v5  ;;  %v4870_v57 = vsub.f32 %v372_v7, %v4817_v10  ;;  %v4887_v7 = vand.u32 4294901760, %v4842_v38 }
  0xcb   : > { %3129 = vmatprep.subr.mxu0 %v4669_v54  ;;  %3119 = vmatpush3.msra.mxu1 %v5923_v47  ;;  %v4862_v47 = vsub.f32 %v4768_v43, %v5801_v11  ;;  %v4879_v11 = vsub.f32 %v4782_v23, %v5802_v34  ;;  %v4912_v34 = vand.u32 4294901760, %v352_v9 }
  0xcc   : > { %3130 = vmatpush3.msra.mxu0 %v4660_v0  ;;  %3120 = vmatprep.subr.mxu1 %v5925_v48  ;;  %5981 = vst [vmem:[#allocation25_spill] sm:$0xff] %v4870_v57  ;;  %5982 = vst [vmem:[#allocation36_spill] sm:$0xff] %v4887_v7  ;;  %v369_v48 = vld [vmem:[%s4058_s18 + $0x1a8] sm:$0xff] }
  0xcd   : > { %3131 = vmatprep.subr.mxu0 %v4680_v28  ;;  %3121 = vmatpush3.msra.mxu1 %v4397_v42  ;;  %v4894_v42 = vsub.f32 %v4793_v19, %v5804_v39  ;;  %v4910_v39 = vsub.f32 %v4812_v6, %v5807_v53  ;;  %5984 = vst [vmem:[#allocation37_spill] sm:$0xff] %v4912_v34  ;;  %v1499_v32 = vand.u32 4294901760, %v4879_v11  ;;  %v5988_v53 = vand.u32 4294901760, %v4753_v62  ;;  %v314_v28 = vld [vmem:[%s4051_s17 + $0x10] sm:$0xff] }
  0xce   : > { %3132 = vmatpush3.msra.mxu0 %v4671_v63  ;;  %3122 = vmatprep.subr.mxu1 %v4412_v21  ;;  %v4905_v21 = vsub.f32 %v355_v56, %v4853_v14  ;;  %v315_v56 = vld [vmem:[%s4051_s17 + $0x18] sm:$0xff] }
  0xcf   : > { %3133 = vmatprep.subr.mxu0 %v4720_v45  ;;  %3123 = vmatpush3.msra.mxu1 %v4430_v25  ;;  %v4915_v45 = vsub.f32 %v371_v58, %v4851_v61  ;;  %v1492_v25 = vand.u32 4294901760, %v4862_v47  ;;  %v5986_v58 = vand.u32 4294901760, %v4748_v2  ;;  %v351_v47 = vld [vmem:[%s4058_s18 + $0x118] sm:$0xff]  ;;  %v5989_v2 = vand.u32 4294901760, %v4846_v36 }
  0xd0   : > { %1235 = vmatprep.mubr.f32.mxu1 %v5970_v51  ;;  %3134 = vmatpush3.msra.mxu0 %v4695_v52  ;;  %v4921_v51 = vsub.f32 %v354_v1, %v4867_v37  ;;  %v4930_v52 = vand.u32 4294901760, %v369_v48  ;;  %v4932_v1 = vand.u32 4294901760, %v368_v15  ;;  %v1506_v62 = vand.u32 4294901760, %v4910_v39 }
  0xd1   : > { %1237 = vmatmul.mubr.f32.vlgmr.msra.gmra.mxu1 %v5973_v59  ;;  %3135 = vmatprep.subr.mxu0 %v4730_v46  ;;  %v1387_v59 = vand.u32 4294901760, %v4884_v18  ;;  %v4943_v11 = vsub.f32 %v4846_v36, %v5989_v2  ;;  %v4946_v18 = vsub.f32 %v353_v31, %v4898_v8  ;;  %v367_v2 = vld [vmem:[%s4058_s18 + $0x198] sm:$0xff]  ;;  %v4964_v46 = vsub.f32 %v4842_v38, %v4887_v7 }
  0xd2   : > { %5985 = vst [vmem:[#allocation33_spill] sm:$0xff] %v4921_v51  ;;  %3162 = vmatprep.subr.mxu1 %v5986_v58  ;;  %5987 = vst [vmem:[#allocation27_spill] sm:$0xff] %v4930_v52  ;;  %3136 = vmatpush3.msra.mxu0 %v4732_v44  ;;  %v5990_v58 = vand.u32 4294901760, %v4827_v33  ;;  %v350_v44 = vld [vmem:[%s4058_s18 + $0x110] sm:$0xff]  ;;  %v5994_v39 = vand.u32 4294901760, %v4865_v5  ;;  %v4979_v31 = vand.u32 4294901760, %v351_v47 }
  0xd3   : > { %3163 = vmatpush3.msra.mxu1 %v5988_v53  ;;  %3137 = vmatprep.subr.mxu0 %v4755_v4  ;;  %v4958_v53 = vsub.f32 %v352_v9, %v4912_v34  ;;  %v5993_v4 = vand.u32 4294901760, %v4870_v57  ;;  %v4982_v38 = vand.u32 4294901760, %v315_v56 }
  0xd4   : > { %v4951_v63 = vsub.f32 %v4827_v33, %v5990_v58  ;;  %3164 = vmatprep.subr.mxu1 %v1478_v27  ;;  %3138 = vmatpush3.msra.mxu0 %v4738_v60  ;;  %v5992_v58 = vand.u32 4294901760, %v4765_v29  ;;  %v4977_v9 = vsub.f32 %v4865_v5, %v5994_v39  ;;  %v366_v33 = vld [vmem:[%s4058_s18 + $0x190] sm:$0xff]  ;;  %v5996_v29 = vand.u32 4294901760, %v4809_v26 }
  0xd5   : > { %5991 = vst [vmem:[#allocation34_spill] sm:$0xff] %v4958_v53  ;;  %v4972_v27 = vsub.f32 %v4870_v57, %v5993_v4  ;;  %5995 = vst [vmem:[#allocation38_spill] sm:$0xff] %v4982_v38  ;;  %3139 = vmatprep.subr.mxu0 %v4795_v22  ;;  %v4988_v4 = vand.u32 4294901760, %v350_v44  ;;  %v4991_v60 = vsub.f32 %v369_v48, %v4930_v52  ;;  %v4993_v39 = vand.u32 4294901760, %v314_v28 }
  0xd6   : > { %3165 = vmatpush3.msra.mxu1 %v5992_v58  ;;  %3140 = vmatpush3.msra.mxu0 %v4776_v17  ;;  %v5998_v5 = vand.u32 4294901760, %v4800_v50  ;;  %v1513_v22 = vand.u32 4294901760, %v4943_v11  ;;  %v1401_v26 = vand.u32 4294901760, %v4951_v63  ;;  %v5999_v48 = vand.u32 4294901760, %v4915_v45 }
  0xd7   : > { %3166 = vmatprep.subr.mxu1 %v5996_v29  ;;  %5997 = vst [vmem:[#allocation39_spill] sm:$0xff] %v4993_v39  ;;  %v5000_v29 = vand.u32 4294901760, %v367_v2  ;;  %3141 = vmatprep.subr.mxu0 %v4817_v10  ;;  %v5009_v17 = vand.u32 4294901760, %v366_v33  ;;  %v5014_v63 = vsub.f32 %v368_v15, %v4932_v1  ;;  %v6001_v11 = vand.u32 4294901760, %v4832_v40  ;;  %v349_v10 = vld [vmem:[%s4058_s18 + $0x108] sm:$0xff] }
  0xd8   : > { %3167 = vmatpush3.msra.mxu1 %v5998_v5  ;;  %v5007_v57 = vsub.f32 %v4915_v45, %v5999_v48  ;;  %v365_v5 = vld [vmem:[%s4058_s18 + $0x188] sm:$0xff]  ;;  %3142 = vmatpush3.msra.mxu0 %v4820_v55  ;;  %v1408_v48 = vand.u32 4294901760, %v4977_v9  ;;  %v5022_v58 = vsub.f32 %v351_v47, %v4979_v31  ;;  %v5026_v50 = vsub.f32 %v315_v56, %v4982_v38  ;;  %v364_v9 = vld [vmem:[%s4058_s18 + $0x180] sm:$0xff] }
  0xd9   : > { %3168 = vmatprep.subr.mxu1 %v1492_v25  ;;  %6000 = vst [vmem:[#allocation40_spill] sm:$0xff] %v5009_v17  ;;  %v1520_v25 = vand.u32 4294901760, %v4972_v27  ;;  %3143 = vmatprep.subr.mxu0 %v4851_v61  ;;  %v6002_v15 = vand.u32 4294901760, %v4905_v21  ;;  %v5033_v40 = vsub.f32 %v350_v44, %v4988_v4  ;;  %v5039_v47 = vsub.f32 %v314_v28, %v4993_v39 }
  0xda   : > { %3169 = vmatpush3.msra.mxu1 %v6001_v11  ;;  %v348_v11 = vld [vmem:[%s4058_s18 + $0x100] sm:$0xff]  ;;  %3144 = vmatpush3.msra.mxu0 %v4853_v14  ;;  %v6003_v56 = vand.u32 4294901760, %v4921_v51  ;;  %v5045_v61 = vand.u32 4294901760, %v365_v5  ;;  %v5049_v44 = vsub.f32 %v367_v2, %v5000_v29  ;;  %v1527_v28 = vand.u32 4294901760, %v5007_v57 }
  0xdb   : > { %3170 = vmatprep.subr.mxu1 %v1499_v32  ;;  %v1414_v55 = vsub.f32 %v4905_v21, %v6002_v15  ;;  %3145 = vmatprep.subr.mxu0 %v4887_v7  ;;  %v6004_v27 = vand.u32 4294901760, %v4964_v46  ;;  %v5056_v14 = vand.u32 4294901760, %v349_v10  ;;  %v6005_v15 = vand.u32 4294901760, %v4894_v42 }
  0xdc   : > { %3171 = vmatpush3.msra.mxu1 %v1387_v59  ;;  %v1421_v32 = vsub.f32 %v4921_v51, %v6003_v56  ;;  %3146 = vmatpush3.msra.mxu0 %v4867_v37  ;;  %v5062_v2 = vand.u32 4294901760, %v364_v9  ;;  %v5064_v51 = vand.u32 4294901760, %v348_v11  ;;  %v5068_v57 = vsub.f32 %v366_v33, %v5009_v17 }
  0xdd   : > { %3172 = vmatprep.subr.mxu1 %v1506_v62  ;;  %v1533_v59 = vsub.f32 %v4964_v46, %v6004_v27  ;;  %3147 = vmatprep.subr.mxu0 %v4930_v52  ;;  %v1415_v27 = vand.u32 4294901760, %v1414_v55  ;;  %v6006_v56 = vand.u32 4294901760, %v4991_v60  ;;  %v5848_v42 = vand.u32 4294901760, %v4958_v53 }
  0xde   : > { %3173 = vmatpush3.msra.mxu1 %v6005_v15  ;;  %3148 = vmatpush3.msra.mxu0 %v4898_v8  ;;  %v1422_v7 = vand.u32 4294901760, %v1421_v32  ;;  %v6007_v62 = vand.u32 4294901760, %v4946_v18  ;;  %v6008_v15 = vand.u32 4294901760, %v5014_v63 }
  0xdf   : > { %3174 = vmatprep.subr.mxu1 %v1513_v22  ;;  %v1540_v37 = vsub.f32 %v4991_v60, %v6006_v56  ;;  %v5082_v22 = vsub.f32 %v365_v5, %v5045_v61  ;;  %3149 = vmatprep.subr.mxu0 %v4932_v1  ;;  %v1534_v55 = vand.u32 4294901760, %v1533_v59  ;;  %v5086_v56 = vsub.f32 %v349_v10, %v5056_v14 }
  0xe0   : > { %3175 = vmatpush3.msra.mxu1 %v1401_v26  ;;  %v1428_v33 = vsub.f32 %v4946_v18, %v6007_v62  ;;  %v1547_v26 = vsub.f32 %v5014_v63, %v6008_v15  ;;  %3150 = vmatpush3.msra.mxu0 %v4912_v34  ;;  %v5094_v62 = vsub.f32 %v348_v11, %v5064_v51  ;;  %v6010_v5 = vand.u32 4294901760, %v5026_v50 }
  0xe1   : > { %3176 = vmatprep.subr.mxu1 %v1520_v25  ;;  %v5101_v10 = vsub.f32 %v364_v9, %v5062_v2  ;;  %3151 = vmatprep.subr.mxu0 %v5000_v29  ;;  %v1541_v15 = vand.u32 4294901760, %v1540_v37  ;;  %v6012_v11 = vand.u32 4294901760, %v5039_v47  ;;  %v6013_v9 = vand.u32 4294901760, %v5049_v44 }
  0xe2   : > { %3177 = vmatpush3.msra.mxu1 %v1408_v48  ;;  %6009 = vst [vmem:[#allocation41_spill] sm:$0xff] %v5094_v62  ;;  %v1341_v25 = vsub.f32 %v5026_v50, %v6010_v5  ;;  %v1435_v48 = vsub.f32 %v4958_v53, %v5848_v42  ;;  %3152 = vmatpush3.msra.mxu0 %v4979_v31  ;;  %v1429_v5 = vand.u32 4294901760, %v1428_v33  ;;  %v6014_v42 = vand.u32 4294901760, %v5022_v58 }
  0xe3   : > { %6011 = vst [vmem:[#allocation42_spill] sm:$0xff] %v5101_v10  ;;  %3178 = vmatprep.subr.mxu1 %v1527_v28  ;;  %v1347_v32 = vsub.f32 %v5039_v47, %v6012_v11  ;;  %v1554_v59 = vsub.f32 %v5049_v44, %v6013_v9  ;;  %3153 = vmatprep.subr.mxu0 %v5009_v17  ;;  %v1548_v28 = vand.u32 4294901760, %v1547_v26  ;;  %v6015_v33 = vand.u32 4294901760, %v5068_v57 }
  0xe4   : > { %3179 = vmatpush3.msra.mxu1 %v1415_v27  ;;  %v1442_v11 = vsub.f32 %v5022_v58, %v6014_v42  ;;  %3154 = vmatpush3.msra.mxu0 %v4988_v4  ;;  %v1342_v27 = vand.u32 4294901760, %v1341_v25  ;;  %v5852_v37 = vand.u32 4294901760, %v5101_v10  ;;  %v6016_v17 = vand.u32 4294901760, %v5033_v40 }
  0xe5   : > { %3180 = vmatprep.subr.mxu1 %v1534_v55  ;;  %v1561_v9 = vsub.f32 %v5068_v57, %v6015_v33  ;;  %3155 = vmatprep.subr.mxu0 %v5045_v61  ;;  %v1436_v55 = vand.u32 4294901760, %v1435_v48  ;;  %v1348_v26 = vand.u32 4294901760, %v1347_v32  ;;  %v5851_v52 = vand.u32 4294901760, %v5094_v62 }
  0xe6   : > { %3181 = vmatpush3.msra.mxu1 %v1422_v7  ;;  %v1449_v42 = vsub.f32 %v5033_v40, %v6016_v17  ;;  %3156 = vmatpush3.msra.mxu0 %v5056_v14  ;;  %v1555_v7 = vand.u32 4294901760, %v1554_v59  ;;  %v6017_v25 = vand.u32 4294901760, %v5082_v22  ;;  %v6018_v32 = vand.u32 4294901760, %v5086_v56 }
  0xe7   : > { %3182 = vmatprep.subr.mxu1 %v1541_v15  ;;  %3157 = vmatprep.subr.mxu0 %v5062_v2  ;;  %v1443_v15 = vand.u32 4294901760, %v1442_v11  ;;  %v1562_v17 = vand.u32 4294901760, %v1561_v9  ;;  %v1575_v59 = vsub.f32 %v5101_v10, %v5852_v37  ;;  %v6036_v37 = vld [vmem:[#allocation30_spill] sm:$0xff] }
  0xe8   : > { %3183 = vmatpush3.msra.mxu1 %v1429_v5  ;;  %v1568_v33 = vsub.f32 %v5082_v22, %v6017_v25  ;;  %v1456_v48 = vsub.f32 %v5086_v56, %v6018_v32  ;;  %3158 = vmatpush3.msra.mxu0 %v5064_v51  ;;  %v1450_v5 = vand.u32 4294901760, %v1449_v42  ;;  %v6020_v42 = vld [vmem:[#allocation28_spill] sm:$0xff]  ;;  %v6022_v25 = vld [vmem:[#allocation25_spill] sm:$0xff] }
  0xe9   : > { %3184 = vmatprep.subr.mxu1 %v1548_v28  ;;  %1343 = vmatprep.mubr.f32.mxu0 %v1342_v27  ;;  %v1463_v28 = vsub.f32 %v5094_v62, %v5851_v52  ;;  %v1576_v9 = vand.u32 4294901760, %v1575_v59  ;;  %v6025_v32 = vld [vmem:[#allocation32_spill] sm:$0xff]  ;;  %v6035_v52 = vld [vmem:[#allocation29_spill] sm:$0xff] }
  0xea   : > { %3185 = vmatpush3.msra.mxu1 %v1436_v55  ;;  %1349 = vmatmul.mubr.f32.vlgmr.msra.gmra.mxu0 %v1348_v26  ;;  %v1569_v11 = vand.u32 4294901760, %v1568_v33  ;;  %v1457_v27 = vand.u32 4294901760, %v1456_v48  ;;  %v6019_v26 = vld [vmem:[#allocation15_spill] sm:$0xff]  ;;  %v6023_v33 = vld [vmem:[#allocation16_spill] sm:$0xff]  ;;  %v6026_v48 = vld [vmem:[#allocation17_spill] sm:$0xff] }
  0xeb   : > { %3186 = vmatprep.subr.mxu1 %v1555_v7  ;;  %3197 = vmatprep.subr.mxu0 %v4683_v3  ;;  %v1464_v55 = vand.u32 4294901760, %v1463_v28  ;;  %v6021_v7 = vld [vmem:[#allocation14_spill] sm:$0xff]  ;;  %v6028_v59 = vld [vmem:[#allocation20_spill] sm:$0xff]  ;;  %v6030_v28 = vld [vmem:[#allocation19_spill] sm:$0xff] }
  0xec   : > { %3187 = vmatpush3.msra.mxu1 %v1443_v15  ;;  %3198 = vmatpush3.msra.mxu0 %v4678_v20  ;;  %v6024_v15 = vld [vmem:[#allocation31_spill] sm:$0xff] }
  0xed   : > { %3188 = vmatprep.subr.mxu1 %v1562_v17  ;;  %3199 = vmatprep.subr.mxu0 %v4706_v24  ;;  %v6027_v17 = vld [vmem:[#allocation18_spill] sm:$0xff] }
  0xee   : > { %3189 = vmatpush3.msra.mxu1 %v1450_v5  ;;  %3200 = vmatpush3.msra.mxu0 %v4689_v13  ;;  %v6029_v5 = vld [vmem:[#allocation33_spill] sm:$0xff] }
  0xef   : > { %3190 = vmatprep.subr.mxu1 %v1569_v11  ;;  %3201 = vmatprep.subr.mxu0 %v4715_v35  ;;  %v6031_v11 = vld [vmem:[#allocation22_spill] sm:$0xff] }
  0xf0   : > { %3191 = vmatpush3.msra.mxu1 %v1457_v27  ;;  %3202 = vmatpush3.msra.mxu0 %v4701_v30  ;;  %v6032_v27 = vld [vmem:[#allocation21_spill] sm:$0xff] }
  0xf1   : > { %3192 = vmatprep.subr.mxu1 %v1576_v9  ;;  %3203 = vmatprep.subr.mxu0 %v4768_v43  ;;  %v6033_v9 = vld [vmem:[#allocation23_spill] sm:$0xff] }
  0xf2   : > { %3193 = vmatpush3.msra.mxu1 %v1464_v55  ;;  %1579 = vmatprep.mubr.f32.mxu1 %v4982_v38  ;;  %v6034_v55 = vld [vmem:[#allocation24_spill] sm:$0xff]  ;;  %v6038_v38 = vld [vmem:[#allocation35_spill] sm:$0xff] }
  0xf3   : > { %3204 = vmatpush3.msra.mxu0 %v4728_v41  ;;  %1581 = vmatmul.mubr.f32.vlgmr.msra.gmra.mxu1 %v4993_v39  ;;  %v6037_v39 = vld [vmem:[#allocation36_spill] sm:$0xff] }
  0xf4   : > { %3205 = vmatprep.subr.mxu0 %v4782_v23  ;;  %3232 = vmatprep.subr.mxu1 %v4651_v12 }
  0xf5   : > { %3206 = vmatpush3.msra.mxu0 %v4774_v16  ;;  %3233 = vmatpush3.msra.mxu1 %v4653_v49 }
  0xf6   : > { %3207 = vmatprep.subr.mxu0 %v4812_v6  ;;  %3234 = vmatprep.subr.mxu1 %v4669_v54 }
  0xf7   : > { %3208 = vmatpush3.msra.mxu0 %v4793_v19  ;;  %3235 = vmatpush3.msra.mxu1 %v4660_v0 }
  0xf8   : > { %3209 = vmatprep.subr.mxu0 %v4846_v36  ;;  %3236 = vmatprep.subr.mxu1 %v6019_v26 }
  0xf9   : > { %3210 = vmatpush3.msra.mxu0 %v6020_v42  ;;  %3237 = vmatpush3.msra.mxu1 %v6021_v7 }
  0xfa   : > { %3211 = vmatprep.subr.mxu0 %v6022_v25  ;;  %3238 = vmatprep.subr.mxu1 %v6023_v33 }
  0xfb   : > { %3212 = vmatpush3.msra.mxu0 %v6024_v15  ;;  %3239 = vmatpush3.msra.mxu1 %v6025_v32 }
  0xfc   : > { %3213 = vmatprep.subr.mxu0 %v4915_v45  ;;  %3240 = vmatprep.subr.mxu1 %v6026_v48 }
  0xfd   : > { %3214 = vmatpush3.msra.mxu0 %v4905_v21  ;;  %3241 = vmatpush3.msra.mxu1 %v6027_v17 }
  0xfe   : > { %3215 = vmatprep.subr.mxu0 %v4964_v46  ;;  %3242 = vmatprep.subr.mxu1 %v6028_v59 }
  0xff   : > { %3216 = vmatpush3.msra.mxu0 %v6029_v5  ;;  %3243 = vmatpush3.msra.mxu1 %v6030_v28 }
 0x100   : > { %3217 = vmatprep.subr.mxu0 %v4991_v60  ;;  %3244 = vmatprep.subr.mxu1 %v6031_v11 }
 0x101   : > { %3218 = vmatpush3.msra.mxu0 %v4946_v18  ;;  %3245 = vmatpush3.msra.mxu1 %v6032_v27 }
 0x102   : > { %3219 = vmatprep.subr.mxu0 %v5014_v63  ;;  %3246 = vmatprep.subr.mxu1 %v6033_v9 }
 0x103   : > { %3220 = vmatpush3.msra.mxu0 %v4958_v53  ;;  %3247 = vmatpush3.msra.mxu1 %v6034_v55  ;;  %v6039_v53 = vld [vmem:[#allocation27_spill] sm:$0xff] }
 0x104   : > { %3221 = vmatprep.subr.mxu0 %v5049_v44  ;;  %3248 = vmatprep.subr.mxu1 %v6035_v52 }
 0x105   : > { %3222 = vmatpush3.msra.mxu0 %v5022_v58  ;;  %3249 = vmatpush3.msra.mxu1 %v6036_v37 }
 0x106   : > { %3223 = vmatprep.subr.mxu0 %v5068_v57  ;;  %3250 = vmatprep.subr.mxu1 %v6037_v39 }
 0x107   : > { %3224 = vmatpush3.msra.mxu0 %v5033_v40  ;;  %3251 = vmatpush3.msra.mxu1 %v6038_v38 }
 0x108   : > { %3225 = vmatprep.subr.mxu0 %v5082_v22  ;;  %3252 = vmatprep.subr.mxu1 %v6039_v53  ;;  %v6040_v53 = vand.u32 4294901760, %v4683_v3  ;;  %v6045_v3 = vand.u32 4294901760, %v4715_v35  ;;  %v6050_v35 = vand.u32 4294901760, %v5039_v47 }
 0x109   : > { %3226 = vmatpush3.msra.mxu0 %v5086_v56  ;;  %3253 = vmatpush3.msra.mxu1 %v4898_v8  ;;  %v6041_v8 = vand.u32 4294901760, %v4678_v20  ;;  %v6046_v20 = vand.u32 4294901760, %v4701_v30  ;;  %v6052_v30 = vand.u32 4294901760, %v4774_v16  ;;  %v6061_v16 = vand.u32 4294901760, %v4964_v46 }
 0x10a   : > { %3227 = vmatprep.subr.mxu0 %v5101_v10  ;;  %3254 = vmatprep.subr.mxu1 %v4932_v1  ;;  %v6042_v10 = vld [vmem:[#allocation40_spill] sm:$0xff]  ;;  %v6065_v46 = vand.u32 4294901760, %v5014_v63  ;;  %v6071_v63 = vand.u32 4294901760, %v5033_v40 }
 0x10b   : > { %3228 = vmatpush3.msra.mxu0 %v5094_v62  ;;  %1716 = vmatprep.mubr.f32.mxu0 %v5026_v50  ;;  %v6043_v62 = vand.u32 4294901760, %v4706_v24  ;;  %v6047_v24 = vand.u32 4294901760, %v4768_v43  ;;  %v6053_v43 = vand.u32 4294901760, %v4812_v6  ;;  %v6064_v6 = vand.u32 4294901760, %v4946_v18 }
 0x10c   : > { %3255 = vmatpush3.msra.mxu1 %v4912_v34  ;;  %1719 = vmatmul.mubr.f32.vlgmr.msra.gmra.mxu0 %v5039_v47  ;;  %v6044_v34 = vand.u32 4294901760, %v4689_v13  ;;  %v6048_v13 = vand.u32 4294901760, %v5026_v50  ;;  %v6069_v18 = vand.u32 4294901760, %v5022_v58  ;;  %v6070_v50 = vand.u32 4294901760, %v5068_v57  ;;  %v6075_v58 = vld [vmem:[#allocation26_spill] sm:$0xff] }
 0x10d   : > { %3256 = vmatprep.subr.mxu1 %v5000_v29  ;;  %3267 = vmatprep.subr.mxu0 %v6040_v53  ;;  %v6072_v47 = vand.u32 4294901760, %v5082_v22  ;;  %v6082_v22 = vld [vmem:[#allocation39_spill] sm:$0xff] }
 0x10e   : > { %3257 = vmatpush3.msra.mxu1 %v4979_v31  ;;  %3268 = vmatpush3.msra.mxu0 %v6041_v8  ;;  %v6049_v8 = vand.u32 4294901760, %v4728_v41  ;;  %v6054_v41 = vand.u32 4294901760, %v4793_v19  ;;  %v6062_v19 = vand.u32 4294901760, %v6029_v5 }
 0x10f   : > { %3258 = vmatprep.subr.mxu1 %v6042_v10  ;;  %3269 = vmatprep.subr.mxu0 %v6043_v62  ;;  %v6076_v62 = vld [vmem:[#allocation42_spill] sm:$0xff] }
 0x110   : > { %3259 = vmatpush3.msra.mxu1 %v4988_v4  ;;  %3270 = vmatpush3.msra.mxu0 %v6044_v34  ;;  %v6051_v34 = vand.u32 4294901760, %v4782_v23  ;;  %v6055_v23 = vand.u32 4294901760, %v4846_v36  ;;  %v6060_v36 = vand.u32 4294901760, %v4905_v21  ;;  %v6066_v21 = vld [vmem:[#allocation34_spill] sm:$0xff]  ;;  %v6077_v57 = vand.u32 4294901760, %v6076_v62 }
 0x111   : > { %3260 = vmatprep.subr.mxu1 %v5045_v61  ;;  %3271 = vmatprep.subr.mxu0 %v6045_v3  ;;  %v6067_v53 = vand.u32 4294901760, %v6066_v21 }
 0x112   : > { %3261 = vmatpush3.msra.mxu1 %v5056_v14  ;;  %3272 = vmatpush3.msra.mxu0 %v6046_v20 }
 0x113   : > { %3262 = vmatprep.subr.mxu1 %v5062_v2  ;;  %3273 = vmatprep.subr.mxu0 %v6047_v24 }
 0x114   : > { %3263 = vmatpush3.msra.mxu1 %v5064_v51  ;;  %1823 = vmatprep.mubr.f32.mxu1 %v6048_v13 }
 0x115   : > { %3274 = vmatpush3.msra.mxu0 %v6049_v8  ;;  %1827 = vmatmul.mubr.f32.vlgmr.msra.gmra.mxu1 %v6050_v35 }
 0x116   : > { %3275 = vmatprep.subr.mxu0 %v6051_v34  ;;  %3302 = vmatprep.subr.mxu1 %v4651_v12  ;;  %v6056_v12 = vand.u32 4294901760, %v6020_v42 }
 0x117   : > { %3276 = vmatpush3.msra.mxu0 %v6052_v30  ;;  %3303 = vmatpush3.msra.mxu1 %v4653_v49  ;;  %v6057_v49 = vand.u32 4294901760, %v6022_v25 }
 0x118   : > { %3277 = vmatprep.subr.mxu0 %v6053_v43  ;;  %3304 = vmatprep.subr.mxu1 %v4669_v54  ;;  %v6058_v54 = vand.u32 4294901760, %v6024_v15 }
 0x119   : > { %3278 = vmatpush3.msra.mxu0 %v6054_v41  ;;  %3305 = vmatpush3.msra.mxu1 %v4660_v0  ;;  %v6059_v0 = vand.u32 4294901760, %v4915_v45  ;;  %v6063_v45 = vand.u32 4294901760, %v4991_v60  ;;  %v6068_v60 = vand.u32 4294901760, %v5049_v44  ;;  %v6073_v44 = vld [vmem:[#allocation27_spill] sm:$0xff] }
 0x11a   : > { %3279 = vmatprep.subr.mxu0 %v6055_v23  ;;  %3306 = vmatprep.subr.mxu1 %v6019_v26 }
 0x11b   : > { %3280 = vmatpush3.msra.mxu0 %v6056_v12  ;;  %3307 = vmatpush3.msra.mxu1 %v6021_v7 }
 0x11c   : > { %3281 = vmatprep.subr.mxu0 %v6057_v49  ;;  %3308 = vmatprep.subr.mxu1 %v6023_v33 }
 0x11d   : > { %3282 = vmatpush3.msra.mxu0 %v6058_v54  ;;  %3309 = vmatpush3.msra.mxu1 %v6025_v32 }
 0x11e   : > { %3283 = vmatprep.subr.mxu0 %v6059_v0  ;;  %3310 = vmatprep.subr.mxu1 %v6026_v48 }
 0x11f   : > { %3284 = vmatpush3.msra.mxu0 %v6060_v36  ;;  %3311 = vmatpush3.msra.mxu1 %v6027_v17 }
 0x120   : > { %3285 = vmatprep.subr.mxu0 %v6061_v16  ;;  %3312 = vmatprep.subr.mxu1 %v6028_v59 }
 0x121   : > { %3286 = vmatpush3.msra.mxu0 %v6062_v19  ;;  %3313 = vmatpush3.msra.mxu1 %v6030_v28 }
 0x122   : > { %3287 = vmatprep.subr.mxu0 %v6063_v45  ;;  %3314 = vmatprep.subr.mxu1 %v6031_v11 }
 0x123   : > { %3288 = vmatpush3.msra.mxu0 %v6064_v6  ;;  %3315 = vmatpush3.msra.mxu1 %v6032_v27 }
 0x124   : > { %3289 = vmatprep.subr.mxu0 %v6065_v46  ;;  %3316 = vmatprep.subr.mxu1 %v6033_v9  ;;  %v311_v46 = vld [vmem:[#allocation2] sm:$0xff] }
 0x125   : > { %3290 = vmatpush3.msra.mxu0 %v6067_v53  ;;  %3317 = vmatpush3.msra.mxu1 %v6034_v55 }
 0x126   : > { %3291 = vmatprep.subr.mxu0 %v6068_v60  ;;  %3318 = vmatprep.subr.mxu1 %v6035_v52  ;;  %v6074_v52 = vand.u32 4294901760, %v5086_v56 }
 0x127   : > { %3292 = vmatpush3.msra.mxu0 %v6069_v18  ;;  %3319 = vmatpush3.msra.mxu1 %v6036_v37  ;;  %v6080_v37 = vld [vmem:[#allocation38_spill] sm:$0xff] }
 0x128   : > { %3293 = vmatprep.subr.mxu0 %v6070_v50  ;;  %3320 = vmatprep.subr.mxu1 %v6037_v39  ;;  %v6078_v39 = vld [vmem:[#allocation41_spill] sm:$0xff] }
 0x129   : > { %3294 = vmatpush3.msra.mxu0 %v6071_v63  ;;  %3321 = vmatpush3.msra.mxu1 %v6038_v38  ;;  %v6079_v40 = vand.u32 4294901760, %v6078_v39  ;;  %v6081_v38 = vld [vmem:[#allocation37_spill] sm:$0xff] }
 0x12a   : > { %3295 = vmatprep.subr.mxu0 %v6072_v47  ;;  %3322 = vmatprep.subr.mxu1 %v6073_v44 }
 0x12b   : > { %3296 = vmatpush3.msra.mxu0 %v6074_v52  ;;  %3323 = vmatpush3.msra.mxu1 %v6075_v58 }
 0x12c   : > { %3297 = vmatprep.subr.mxu0 %v6077_v57  ;;  %3324 = vmatprep.subr.mxu1 %v4932_v1 }
 0x12d   : > { %3298 = vmatpush3.msra.mxu0 %v6079_v40  ;;  %1993 = vmatprep.mubr.f32.mxu0 %v6080_v37 }
 0x12e   : > { %3325 = vmatpush3.msra.mxu1 %v6081_v38  ;;  %1995 = vmatmul.mubr.f32.vlgmr.msra.gmra.mxu0 %v6082_v22 }
 0x12f   : > { %3326 = vmatprep.subr.mxu1 %v5000_v29  ;;  %2097 = vmatprep.mubr.f32.mxu1 %v6080_v37 }
 0x130   : > { %3327 = vmatpush3.msra.mxu1 %v4979_v31 }
 0x131   : > { %3328 = vmatprep.subr.mxu1 %v6042_v10 }
 0x132   : > { %3329 = vmatpush3.msra.mxu1 %v4988_v4 }
 0x133   : > { %3330 = vmatprep.subr.mxu1 %v5045_v61 }
 0x134   : > { %3331 = vmatpush3.msra.mxu1 %v5056_v14 }
 0x135   : > { %3332 = vmatprep.subr.mxu1 %v5062_v2 }
 0x136   : > { %3333 = vmatpush3.msra.mxu1 %v5064_v51 }
 0x137   : > { %2099 = vmatmul.mubr.f32.vlgmr.msra.gmra.mxu1 %v6082_v22 }
 0x146   : > { %v2949_v1 = vpop.f32.mrf.mxu0 }
 0x148   : > { %v2950_v29 = vpop.f32.mrf.mxu0 }
 0x149   : > { %v2951_v32 = vadd.f32 %v2950_v29, %v2949_v1 }
 0x14d   : > { %v2984_v56 = vpop.f32.mrf.mxu1 }
 0x14f   : > { %v2985_v42 = vpop.f32.mrf.mxu1 }
 0x150   : > { %v2986_v15 = vadd.f32 %v2985_v42, %v2984_v56 }
 0x152   : > { %v721_v17 = vadd.f32 %v2986_v15, %v2951_v32 }
 0x166   : > { %v3019_v26 = vpop.f32.mrf.mxu0 }
 0x168   : > { %v3020_v31 = vpop.f32.mrf.mxu0 }
 0x169   : > { %v3021_v2 = vadd.f32 %v3020_v31, %v3019_v26 }
 0x16b   : > { %v859_v28 = vadd.f32 %v3021_v2, %v721_v17 }
 0x16f   : > { %v3054_v7 = vpop.f32.mrf.mxu1 }
 0x171   : > { %v3055_v25 = vpop.f32.mrf.mxu1 }
 0x172   : > { %v3056_v59 = vadd.f32 %v3055_v25, %v3054_v7 }
 0x174   : > { %v967_v9 = vadd.f32 %v3056_v59, %v859_v28 }
 0x188   : > { %v3089_v10 = vpop.f32.mrf.mxu0 }
 0x18a   : > { %v3090_v4 = vpop.f32.mrf.mxu0 }
 0x18b   : > { %v3091_v11 = vadd.f32 %v3090_v4, %v3089_v10 }
 0x18d   : > { %v1135_v24 = vadd.f32 %v3091_v11, %v967_v9 }
 0x191   : > { %v3124_v33 = vpop.f32.mrf.mxu1 }
 0x193   : > { %v3125_v14 = vpop.f32.mrf.mxu1 }
 0x194   : > { %v3126_v55 = vadd.f32 %v3125_v14, %v3124_v33 }
 0x196   : > { %v1239_v35 = vadd.f32 %v3126_v55, %v1135_v24 }
 0x1aa   : > { %v3159_v61 = vpop.f32.mrf.mxu0 }
 0x1ac   : > { %v3160_v48 = vpop.f32.mrf.mxu0 }
 0x1ad   : > { %v3161_v13 = vadd.f32 %v3160_v48, %v3159_v61 }
 0x1af   : > { %v1351_v43 = vadd.f32 %v3161_v13, %v1239_v35 }
 0x1b3   : > { %v3194_v51 = vpop.f32.mrf.mxu1 }
 0x1b5   : > { %v3195_v27 = vpop.f32.mrf.mxu1 }
 0x1b6   : > { %v3196_v34 = vadd.f32 %v3195_v27, %v3194_v51 }
 0x1b8   : > { %v1583_v12 = vadd.f32 %v3196_v34, %v1351_v43 }
 0x1cc   : > { %v3229_v5 = vpop.f32.mrf.mxu0 }
 0x1ce   : > { %v3230_v3 = vpop.f32.mrf.mxu0 }
 0x1cf   : > { %v3231_v41 = vadd.f32 %v3230_v3, %v3229_v5 }
 0x1d1   : > { %v1721_v54 = vadd.f32 %v3231_v41, %v1583_v12 }
 0x1d5   : > { %v3264_v20 = vpop.f32.mrf.mxu1 }
 0x1d7   : > { %v3265_v30 = vpop.f32.mrf.mxu1 }
 0x1d8   : > { %v3266_v49 = vadd.f32 %v3265_v30, %v3264_v20 }
 0x1da   : > { %v1829_v16 = vadd.f32 %v3266_v49, %v1721_v54 }
 0x1ee   : > { %v3299_v8 = vpop.f32.mrf.mxu0 }
 0x1f0   : > { %v3300_v23 = vpop.f32.mrf.mxu0 }
 0x1f1   : > { %v3301_v0 = vadd.f32 %v3300_v23, %v3299_v8 }
 0x1f3   : > { %v1997_v45 = vadd.f32 %v3301_v0, %v1829_v16 }
 0x1f7   : > { %v3334_v36 = vpop.f32.mrf.mxu1 }
 0x1f9   : > { %v3335_v19 = vpop.f32.mrf.mxu1 }
 0x1fa   : > { %v3336_v6 = vadd.f32 %v3335_v19, %v3334_v36 }
 0x1fc   : > { %v2101_v21 = vadd.f32 %v3336_v6, %v1997_v45  ;;  %2109 = sbr.rel (%p2907_p1) target bundleno = 821 (0x335), region = 60 }
 0x1fe   : > { %v2104_v53 = vadd.f32 %v2101_v21, %v311_v46 }
 0x200   : > { %2105 = vst [vmem:[#allocation2] sm:$0xff] %v2104_v53 }
 0x201   : > { %v2135_v60 = vld [vmem:[#allocation8 + $0x78] sm:$0xff]  ;;  %v2134_v18 = vld [vmem:[#allocation8 + $0x70] sm:$0xff]  ;;  %v2133_v50 = vld [vmem:[#allocation8 + $0x68] sm:$0xff]  ;;  %v3910_v63 = vmov 0.0   ;;  %vm3911_vm0 = vmmov 0  }
 0x202   : > { %3439 = vmatprep.subr.mxu0 %v3910_v63  ;;  %v5320_v47 = vand.u32 4294901760, %v2135_v60  ;;  %v5322_v44 = vand.u32 4294901760, %v2134_v18  ;;  %v5324_v52 = vand.u32 4294901760, %v2133_v50  ;;  %v2132_v58 = vld [vmem:[#allocation8 + $0x60] sm:$0xff]  ;;  %3474 = vmatprep.subr.mxu1 %v3910_v63  ;;  %v2131_v62 = vld [vmem:[#allocation8 + $0x58] sm:$0xff]  ;;  %v2130_v57 = vld [vmem:[#allocation8 + $0x50] sm:$0xff] }
 0x203   : > { %v5327_v39 = vand.u32 4294901760, %v2132_v58  ;;  %v5329_v40 = vand.u32 4294901760, %v2131_v62  ;;  %v5331_v37 = vand.u32 4294901760, %v2130_v57  ;;  %v2129_v38 = vld [vmem:[#allocation8 + $0x48] sm:$0xff]  ;;  %v2128_v22 = vld [vmem:[#allocation8 + $0x40] sm:$0xff]  ;;  %3471 = vmatprep.mubr.msk.f32.mxu0 %vm3911_vm0, %v3910_v63  ;;  %3506 = vmatprep.mubr.msk.f32.mxu1 %vm3911_vm0, %v3910_v63  ;;  %v2127_v42 = vld [vmem:[#allocation8 + $0x38] sm:$0xff] }
 0x204   : > { %3440 = vmatpush3.msra.mxu0 %v5320_v47  ;;  %v5339_v1 = vsub.f32 %v2135_v60, %v5320_v47  ;;  %v5342_v29 = vsub.f32 %v2134_v18, %v5322_v44  ;;  %v5344_v56 = vand.u32 4294901760, %v2129_v38  ;;  %v5347_v26 = vsub.f32 %v2133_v50, %v5324_v52  ;;  %v2126_v61 = vld [vmem:[#allocation8 + $0x30] sm:$0xff]  ;;  %v2125_v28 = vld [vmem:[#allocation8 + $0x28] sm:$0xff]  ;;  %v2124_v3 = vld [vmem:[#allocation8 + $0x20] sm:$0xff] }
 0x205   : > { %3441 = vmatprep.subr.mxu0 %v3910_v63  ;;  %v5351_v31 = vsub.f32 %v2132_v58, %v5327_v39  ;;  %v5354_v7 = vsub.f32 %v2131_v62, %v5329_v40  ;;  %v5360_v33 = vand.u32 4294901760, %v2128_v22  ;;  %v5364_v14 = vand.u32 4294901760, %v2127_v42  ;;  %v2908_v43 = vld [vmem:[%s5720_s2] ss:$0 sm:$0xff]  ;;  %v2122_v0 = vld [vmem:[#allocation8 + $0x10] sm:$0xff]  ;;  %v2121_v21 = vld [vmem:[#allocation8 + $0x8] sm:$0xff] }
 0x206   : > { %3442 = vmatpush3.msra.mxu0 %v5322_v44  ;;  %v2237_v10 = vand.u32 4294901760, %v5339_v1  ;;  %v2244_v25 = vand.u32 4294901760, %v5342_v29  ;;  %v2251_v4 = vand.u32 4294901760, %v5347_v26  ;;  %v5368_v2 = vsub.f32 %v2130_v57, %v5331_v37  ;;  %v2123_v23 = vld [vmem:[#allocation8 + $0x18] sm:$0xff]  ;;  %v2120_v62 = vld [vmem:[#allocation8] sm:$0xff] }
 0x207   : > { %3443 = vmatprep.subr.mxu0 %v3910_v63  ;;  %v2258_v15 = vand.u32 4294901760, %v5351_v31  ;;  %v2265_v32 = vand.u32 4294901760, %v5354_v7  ;;  %v5381_v59 = vsub.f32 %v2129_v38, %v5344_v56  ;;  %v5384_v5 = vand.u32 4294901760, %v2126_v61  ;;  %v2110_v30 = vld [vmem:[#allocation2] sm:$0xff] }
 0x208   : > { %3444 = vmatpush3.msra.mxu0 %v5324_v52  ;;  %v2238_v48 = vsub.f32 %v5339_v1, %v2237_v10  ;;  %v2245_v51 = vsub.f32 %v5342_v29, %v2244_v25  ;;  %v2252_v17 = vsub.f32 %v5347_v26, %v2251_v4  ;;  %v2272_v55 = vand.u32 4294901760, %v5368_v2 }
 0x209   : > { %3445 = vmatprep.subr.mxu0 %v3910_v63  ;;  %v2259_v9 = vsub.f32 %v5351_v31, %v2258_v15  ;;  %v2266_v20 = vsub.f32 %v5354_v7, %v2265_v32  ;;  %v5396_v24 = vsub.f32 %v2128_v22, %v5360_v33  ;;  %v5399_v8 = vand.u32 4294901760, %v2125_v28 }
 0x20a   : > { %3446 = vmatpush3.msra.mxu0 %v5327_v39  ;;  %v2239_v11 = vand.u32 4294901760, %v2238_v48  ;;  %v2246_v27 = vand.u32 4294901760, %v2245_v51  ;;  %v2253_v13 = vand.u32 4294901760, %v2252_v17  ;;  %v2279_v35 = vand.u32 4294901760, %v5381_v59 }
 0x20b   : > { %3447 = vmatprep.subr.mxu0 %v3910_v63  ;;  %v5403_v34 = vsub.f32 %v2127_v42, %v5364_v14  ;;  %v5410_v41 = vand.u32 4294901760, %v2124_v3  ;;  %v2260_v12 = vand.u32 4294901760, %v2259_v9  ;;  %v2273_v49 = vsub.f32 %v5368_v2, %v2272_v55 }
 0x20c   : > { %3448 = vmatpush3.msra.mxu0 %v5329_v40  ;;  %3475 = vmatpush3.msra.mxu1 %v2239_v11  ;;  %v2286_v54 = vand.u32 4294901760, %v5396_v24  ;;  %v5418_v36 = vsub.f32 %v2126_v61, %v5384_v5  ;;  %v2267_v16 = vand.u32 4294901760, %v2266_v20  ;;  %v2118_v19 = vadd.f32 %v2908_v43, %v2110_v30 }
 0x20d   : > { %3449 = vmatprep.subr.mxu0 %v3910_v63  ;;  %3476 = vmatprep.subr.mxu1 %v3910_v63  ;;  %v2280_v45 = vsub.f32 %v5381_v59, %v2279_v35  ;;  %v5426_v6 = vand.u32 4294901760, %v2123_v23  ;;  %v2293_v46 = vand.u32 4294901760, %v5403_v34  ;;  %v5430_v53 = vsub.f32 %v2125_v28, %v5399_v8 }
 0x20e   : > { %3450 = vmatpush3.msra.mxu0 %v5331_v37  ;;  %3477 = vmatpush3.msra.mxu1 %v2246_v27  ;;  %v5434_v60 = vand.u32 4294901760, %v2122_v0  ;;  %3732 = vtanh.f32 %v2118_v19  ;;  %v2274_v18 = vand.u32 4294901760, %v2273_v49  ;;  %v2287_v50 = vsub.f32 %v5396_v24, %v2286_v54 }
 0x20f   : > { %3451 = vmatprep.subr.mxu0 %v3910_v63  ;;  %3478 = vmatprep.subr.mxu1 %v3910_v63  ;;  %v2300_v58 = vand.u32 4294901760, %v5418_v36  ;;  %v5442_v57 = vsub.f32 %v2124_v3, %v5410_v41  ;;  %v5446_v38 = vand.u32 4294901760, %v2121_v21  ;;  %v2281_v22 = vand.u32 4294901760, %v2280_v45 }
 0x210   : > { %3452 = vmatpush3.msra.mxu0 %v5344_v56  ;;  %3479 = vmatpush3.msra.mxu1 %v2253_v13  ;;  %v2294_v42 = vsub.f32 %v5403_v34, %v2293_v46  ;;  %v2307_v61 = vand.u32 4294901760, %v5430_v53  ;;  %v5454_v48 = vsub.f32 %v2123_v23, %v5426_v6  ;;  %v5458_v51 = vand.u32 4294901760, %v2120_v62 }
 0x211   : > { %3453 = vmatprep.subr.mxu0 %v3910_v63  ;;  %3480 = vmatprep.subr.mxu1 %v3910_v63  ;;  %v2288_v17 = vand.u32 4294901760, %v2287_v50  ;;  %v2301_v28 = vsub.f32 %v5418_v36, %v2300_v58  ;;  %v2314_v11 = vand.u32 4294901760, %v5442_v57  ;;  %v5466_v27 = vsub.f32 %v2122_v0, %v5434_v60 }
 0x212   : > { %3454 = vmatpush3.msra.mxu0 %v5360_v33  ;;  %3481 = vmatpush3.msra.mxu1 %v2260_v12  ;;  %v2295_v9 = vand.u32 4294901760, %v2294_v42  ;;  %v2308_v3 = vsub.f32 %v5430_v53, %v2307_v61  ;;  %v2321_v20 = vand.u32 4294901760, %v5454_v48  ;;  %v5476_v13 = vsub.f32 %v2121_v21, %v5446_v38 }
 0x213   : > { %3455 = vmatprep.subr.mxu0 %v3910_v63  ;;  %3482 = vmatprep.subr.mxu1 %v3910_v63  ;;  %v2302_v30 = vand.u32 4294901760, %v2301_v28  ;;  %v2315_v43 = vsub.f32 %v5442_v57, %v2314_v11  ;;  %v2328_v23 = vand.u32 4294901760, %v5466_v27  ;;  %v5486_v12 = vsub.f32 %v2120_v62, %v5458_v51 }
 0x214   : > { %3456 = vmatpush3.msra.mxu0 %v5364_v14  ;;  %3483 = vmatpush3.msra.mxu1 %v2267_v16  ;;  %v2309_v49 = vand.u32 4294901760, %v2308_v3  ;;  %v2322_v0 = vsub.f32 %v5454_v48, %v2321_v20  ;;  %v2335_v16 = vand.u32 4294901760, %v5476_v13 }
 0x215   : > { %3457 = vmatprep.subr.mxu0 %v3910_v63  ;;  %3484 = vmatprep.subr.mxu1 %v3910_v63  ;;  %v2316_v45 = vand.u32 4294901760, %v2315_v43  ;;  %v2329_v21 = vsub.f32 %v5466_v27, %v2328_v23 }
 0x216   : > { %3458 = vmatpush3.msra.mxu0 %v5384_v5  ;;  %3485 = vmatpush3.msra.mxu1 %v2274_v18  ;;  %v2342_v18 = vand.u32 4294901760, %v5486_v12  ;;  %v2323_v62 = vand.u32 4294901760, %v2322_v0 }
 0x217   : > { %3459 = vmatprep.subr.mxu0 %v3910_v63  ;;  %3486 = vmatprep.subr.mxu1 %v3910_v63 }
 0x218   : > { %3460 = vmatpush3.msra.mxu0 %v5399_v8  ;;  %3487 = vmatpush3.msra.mxu1 %v2281_v22  ;;  %v2336_v22 = vsub.f32 %v5476_v13, %v2335_v16  ;;  %v2343_v28 = vsub.f32 %v5486_v12, %v2342_v18 }
 0x219   : > { %3461 = vmatprep.subr.mxu0 %v3910_v63  ;;  %3488 = vmatprep.subr.mxu1 %v3910_v63 }
 0x21a   : > { %3462 = vmatpush3.msra.mxu0 %v5410_v41  ;;  %3489 = vmatpush3.msra.mxu1 %v2288_v17  ;;  %v2330_v17 = vand.u32 4294901760, %v2329_v21  ;;  %v2337_v3 = vand.u32 4294901760, %v2336_v22  ;;  %v2344_v43 = vand.u32 4294901760, %v2343_v28 }
 0x21b   : > { %3463 = vmatprep.subr.mxu0 %v3910_v63  ;;  %3490 = vmatprep.subr.mxu1 %v3910_v63  ;;  %v3733_v19 = vpop.eup %3732 }
 0x21c   : > { %3464 = vmatpush3.msra.mxu0 %v5426_v6  ;;  %3491 = vmatpush3.msra.mxu1 %v2295_v9  ;;  %v5504_v50 = vand.u32 4294901760, %v3733_v19 }
 0x21d   : > { %3465 = vmatprep.subr.mxu0 %v3910_v63  ;;  %3492 = vmatprep.subr.mxu1 %v3910_v63 }
 0x21e   : > { %3466 = vmatpush3.msra.mxu0 %v5434_v60  ;;  %3493 = vmatpush3.msra.mxu1 %v2302_v30  ;;  %v5513_v42 = vsub.f32 %v3733_v19, %v5504_v50 }
 0x21f   : > { %3467 = vmatprep.subr.mxu0 %v3910_v63  ;;  %3494 = vmatprep.subr.mxu1 %v3910_v63 }
 0x220   : > { %3468 = vmatpush3.msra.mxu0 %v5446_v38  ;;  %3495 = vmatpush3.msra.mxu1 %v2309_v49  ;;  %v2226_v9 = vand.u32 4294901760, %v5513_v42 }
 0x221   : > { %3469 = vmatprep.subr.mxu0 %v3910_v63  ;;  %3496 = vmatprep.subr.mxu1 %v3910_v63 }
 0x222   : > { %3470 = vmatpush3.msra.mxu0 %v5458_v51  ;;  %3497 = vmatpush3.msra.mxu1 %v2316_v45  ;;  %v2227_v30 = vsub.f32 %v5513_v42, %v2226_v9 }
 0x223   : > { %3498 = vmatprep.subr.mxu1 %v3910_v63  ;;  %3509 = vmatprep.subr.mxu0 %v3910_v63 }
 0x224   : > { %3499 = vmatpush3.msra.mxu1 %v2323_v62  ;;  %v2228_v49 = vand.u32 4294901760, %v2227_v30 }
 0x225   : > { %3500 = vmatprep.subr.mxu1 %v3910_v63 }
 0x226   : > { %3501 = vmatpush3.msra.mxu1 %v2330_v17  ;;  %3472 = vmatmul.mubr.f32.vlgmr.msra.gmra.mxu0 %v2228_v49 }
 0x227   : > { %3502 = vmatprep.subr.mxu1 %v3910_v63  ;;  %3510 = vmatpush3.msra.mxu0 %v5339_v1 }
 0x228   : > { %3503 = vmatpush3.msra.mxu1 %v2337_v3  ;;  %3511 = vmatprep.subr.mxu0 %v3910_v63 }
 0x229   : > { %3504 = vmatprep.subr.mxu1 %v3910_v63  ;;  %3512 = vmatpush3.msra.mxu0 %v5342_v29 }
 0x22a   : > { %3505 = vmatpush3.msra.mxu1 %v2344_v43  ;;  %3513 = vmatprep.subr.mxu0 %v3910_v63 }
 0x22b   : > { %3507 = vmatmul.mubr.f32.vlgmr.msra.gmra.mxu1 %v5504_v50  ;;  %3544 = vmatprep.subr.mxu1 %v3910_v63 }
 0x22c   : > { %3545 = vmatpush3.msra.mxu1 %v5320_v47  ;;  %3514 = vmatpush3.msra.mxu0 %v5347_v26 }
 0x22d   : > { %3546 = vmatprep.subr.mxu1 %v3910_v63  ;;  %3515 = vmatprep.subr.mxu0 %v3910_v63 }
 0x22e   : > { %3547 = vmatpush3.msra.mxu1 %v5322_v44  ;;  %3516 = vmatpush3.msra.mxu0 %v5351_v31 }
 0x22f   : > { %3548 = vmatprep.subr.mxu1 %v3910_v63  ;;  %3517 = vmatprep.subr.mxu0 %v3910_v63 }
 0x230   : > { %3549 = vmatpush3.msra.mxu1 %v5324_v52  ;;  %3518 = vmatpush3.msra.mxu0 %v5354_v7 }
 0x231   : > { %3550 = vmatprep.subr.mxu1 %v3910_v63  ;;  %3519 = vmatprep.subr.mxu0 %v3910_v63 }
 0x232   : > { %3551 = vmatpush3.msra.mxu1 %v5327_v39  ;;  %3520 = vmatpush3.msra.mxu0 %v5368_v2 }
 0x233   : > { %3552 = vmatprep.subr.mxu1 %v3910_v63  ;;  %3521 = vmatprep.subr.mxu0 %v3910_v63 }
 0x234   : > { %3553 = vmatpush3.msra.mxu1 %v5329_v40  ;;  %3522 = vmatpush3.msra.mxu0 %v5381_v59 }
 0x235   : > { %3554 = vmatprep.subr.mxu1 %v3910_v63  ;;  %3523 = vmatprep.subr.mxu0 %v3910_v63 }
 0x236   : > { %3555 = vmatpush3.msra.mxu1 %v5331_v37  ;;  %3524 = vmatpush3.msra.mxu0 %v5396_v24 }
 0x237   : > { %3556 = vmatprep.subr.mxu1 %v3910_v63  ;;  %3525 = vmatprep.subr.mxu0 %v3910_v63 }
 0x238   : > { %3557 = vmatpush3.msra.mxu1 %v5344_v56  ;;  %3526 = vmatpush3.msra.mxu0 %v5403_v34 }
 0x239   : > { %3558 = vmatprep.subr.mxu1 %v3910_v63  ;;  %3527 = vmatprep.subr.mxu0 %v3910_v63 }
 0x23a   : > { %3559 = vmatpush3.msra.mxu1 %v5360_v33  ;;  %3528 = vmatpush3.msra.mxu0 %v5418_v36 }
 0x23b   : > { %3560 = vmatprep.subr.mxu1 %v3910_v63  ;;  %3529 = vmatprep.subr.mxu0 %v3910_v63 }
 0x23c   : > { %3561 = vmatpush3.msra.mxu1 %v5364_v14  ;;  %3530 = vmatpush3.msra.mxu0 %v5430_v53 }
 0x23d   : > { %3562 = vmatprep.subr.mxu1 %v3910_v63  ;;  %3531 = vmatprep.subr.mxu0 %v3910_v63 }
 0x23e   : > { %3563 = vmatpush3.msra.mxu1 %v5384_v5  ;;  %3532 = vmatpush3.msra.mxu0 %v5442_v57 }
 0x23f   : > { %3564 = vmatprep.subr.mxu1 %v3910_v63  ;;  %3533 = vmatprep.subr.mxu0 %v3910_v63 }
 0x240   : > { %3565 = vmatpush3.msra.mxu1 %v5399_v8  ;;  %3534 = vmatpush3.msra.mxu0 %v5454_v48 }
 0x241   : > { %3566 = vmatprep.subr.mxu1 %v3910_v63  ;;  %3535 = vmatprep.subr.mxu0 %v3910_v63 }
 0x242   : > { %3541 = vmatprep.mubr.msk.f32.mxu0 %vm3911_vm0, %v3910_v63  ;;  %3536 = vmatpush3.msra.mxu0 %v5466_v27 }
 0x243   : > { %3567 = vmatpush3.msra.mxu1 %v5410_v41  ;;  %3537 = vmatprep.subr.mxu0 %v3910_v63 }
 0x244   : > { %3568 = vmatprep.subr.mxu1 %v3910_v63  ;;  %3538 = vmatpush3.msra.mxu0 %v5476_v13 }
 0x245   : > { %3569 = vmatpush3.msra.mxu1 %v5426_v6  ;;  %3539 = vmatprep.subr.mxu0 %v3910_v63 }
 0x246   : > { %3570 = vmatprep.subr.mxu1 %v3910_v63  ;;  %3540 = vmatpush3.msra.mxu0 %v5486_v12 }
 0x247   : > { %3571 = vmatpush3.msra.mxu1 %v5434_v60  ;;  %3542 = vmatmul.mubr.f32.vlgmr.msra.gmra.mxu0 %v5513_v42 }
 0x248   : > { %3579 = vmatprep.subr.mxu0 %v3910_v63  ;;  %3572 = vmatprep.subr.mxu1 %v3910_v63 }
 0x249   : > { %3580 = vmatpush3.msra.mxu0 %v2237_v10  ;;  %3573 = vmatpush3.msra.mxu1 %v5446_v38 }
 0x24a   : > { %3581 = vmatprep.subr.mxu0 %v3910_v63  ;;  %3574 = vmatprep.subr.mxu1 %v3910_v63 }
 0x24b   : > { %3582 = vmatpush3.msra.mxu0 %v2244_v25  ;;  %3575 = vmatpush3.msra.mxu1 %v5458_v51 }
 0x24c   : > { %3583 = vmatprep.subr.mxu0 %v3910_v63  ;;  %3576 = vmatprep.mubr.msk.f32.mxu1 %vm3911_vm0, %v3910_v63 }
 0x24d   : > { %3584 = vmatpush3.msra.mxu0 %v2251_v4  ;;  %3577 = vmatmul.mubr.f32.vlgmr.msra.gmra.mxu1 %v2226_v9 }
 0x24e   : > { %3585 = vmatprep.subr.mxu0 %v3910_v63  ;;  %3614 = vmatprep.subr.mxu1 %v3910_v63 }
 0x24f   : > { %3586 = vmatpush3.msra.mxu0 %v2258_v15  ;;  %3615 = vmatpush3.msra.mxu1 %v5320_v47 }
 0x250   : > { %3587 = vmatprep.subr.mxu0 %v3910_v63  ;;  %3616 = vmatprep.subr.mxu1 %v3910_v63 }
 0x251   : > { %3588 = vmatpush3.msra.mxu0 %v2265_v32  ;;  %3617 = vmatpush3.msra.mxu1 %v5322_v44 }
 0x252   : > { %3589 = vmatprep.subr.mxu0 %v3910_v63  ;;  %3618 = vmatprep.subr.mxu1 %v3910_v63 }
 0x253   : > { %3590 = vmatpush3.msra.mxu0 %v2272_v55  ;;  %3619 = vmatpush3.msra.mxu1 %v5324_v52 }
 0x254   : > { %3591 = vmatprep.subr.mxu0 %v3910_v63  ;;  %3620 = vmatprep.subr.mxu1 %v3910_v63 }
 0x255   : > { %3592 = vmatpush3.msra.mxu0 %v2279_v35  ;;  %3621 = vmatpush3.msra.mxu1 %v5327_v39 }
 0x256   : > { %3593 = vmatprep.subr.mxu0 %v3910_v63  ;;  %3622 = vmatprep.subr.mxu1 %v3910_v63 }
 0x257   : > { %3594 = vmatpush3.msra.mxu0 %v2286_v54  ;;  %3623 = vmatpush3.msra.mxu1 %v5329_v40 }
 0x258   : > { %3595 = vmatprep.subr.mxu0 %v3910_v63  ;;  %3624 = vmatprep.subr.mxu1 %v3910_v63 }
 0x259   : > { %3596 = vmatpush3.msra.mxu0 %v2293_v46  ;;  %3625 = vmatpush3.msra.mxu1 %v5331_v37 }
 0x25a   : > { %3597 = vmatprep.subr.mxu0 %v3910_v63  ;;  %3626 = vmatprep.subr.mxu1 %v3910_v63 }
 0x25b   : > { %3598 = vmatpush3.msra.mxu0 %v2300_v58  ;;  %3627 = vmatpush3.msra.mxu1 %v5344_v56  ;;  %v2909_v56 = vld [vmem:[%s5722_s4] ss:$0 sm:$0xff] }
 0x25c   : > { %3599 = vmatprep.subr.mxu0 %v3910_v63  ;;  %3628 = vmatprep.subr.mxu1 %v3910_v63 }
 0x25d   : > { %3600 = vmatpush3.msra.mxu0 %v2307_v61  ;;  %3629 = vmatpush3.msra.mxu1 %v5360_v33 }
 0x25e   : > { %3601 = vmatprep.subr.mxu0 %v3910_v63  ;;  %3630 = vmatprep.subr.mxu1 %v3910_v63 }
 0x25f   : > { %3602 = vmatpush3.msra.mxu0 %v2314_v11  ;;  %3631 = vmatpush3.msra.mxu1 %v5364_v14 }
 0x260   : > { %3603 = vmatprep.subr.mxu0 %v3910_v63  ;;  %3632 = vmatprep.subr.mxu1 %v3910_v63 }
 0x261   : > { %3604 = vmatpush3.msra.mxu0 %v2321_v20  ;;  %3633 = vmatpush3.msra.mxu1 %v5384_v5 }
 0x262   : > { %3605 = vmatprep.subr.mxu0 %v3910_v63  ;;  %3634 = vmatprep.subr.mxu1 %v3910_v63 }
 0x263   : > { %3606 = vmatpush3.msra.mxu0 %v2328_v23  ;;  %3635 = vmatpush3.msra.mxu1 %v5399_v8 }
 0x264   : > { %3607 = vmatprep.subr.mxu0 %v3910_v63  ;;  %3636 = vmatprep.subr.mxu1 %v3910_v63 }
 0x265   : > { %3608 = vmatpush3.msra.mxu0 %v2335_v16  ;;  %3611 = vmatprep.mubr.msk.f32.mxu0 %vm3911_vm0, %v3910_v63 }
 0x266   : > { %3609 = vmatprep.subr.mxu0 %v3910_v63  ;;  %3637 = vmatpush3.msra.mxu1 %v5410_v41 }
 0x267   : > { %3610 = vmatpush3.msra.mxu0 %v2342_v18  ;;  %3638 = vmatprep.subr.mxu1 %v3910_v63 }
 0x268   : > { %3612 = vmatmul.mubr.f32.vlgmr.msra.gmra.mxu0 %v5504_v50  ;;  %3639 = vmatpush3.msra.mxu1 %v5426_v6 }
 0x269   : > { %3646 = vmatprep.mubr.msk.f32.mxu1 %vm3911_vm0, %v3910_v63  ;;  %3640 = vmatprep.subr.mxu1 %v3910_v63 }
 0x26a   : > { %3641 = vmatpush3.msra.mxu1 %v5434_v60 }
 0x26b   : > { %3642 = vmatprep.subr.mxu1 %v3910_v63 }
 0x26c   : > { %3643 = vmatpush3.msra.mxu1 %v5446_v38 }
 0x26d   : > { %3644 = vmatprep.subr.mxu1 %v3910_v63 }
 0x26e   : > { %3645 = vmatpush3.msra.mxu1 %v5458_v51 }
 0x26f   : > { %3647 = vmatmul.mubr.f32.vlgmr.msra.gmra.mxu1 %v5504_v50 }
 0x2e6   : > { %v2230_v47 = vpop.f32.mrf.mxu0 }
 0x2e7   : > { %v2231_v26 = vadd.f32 %v2909_v56, %v2230_v47 }
 0x2e8   : > { %v3473_v44 = vpop.f32.mrf.mxu0 }
 0x2eb   : > { %v2381_v52 = vpop.f32.mrf.mxu1 }
 0x2ec   : > { %v2382_v7 = vadd.f32 %v2381_v52, %v2231_v26 }
 0x2ed   : > { %v3508_v39 = vpop.f32.mrf.mxu1 }
 0x307   : > { %v2485_v40 = vpop.f32.mrf.mxu0 }
 0x308   : > { %v2486_v10 = vadd.f32 %v2485_v40, %v2382_v7 }
 0x309   : > { %v3543_v37 = vpop.f32.mrf.mxu0 }
 0x30d   : > { %v2574_v1 = vpop.f32.mrf.mxu1 }
 0x30e   : > { %v2575_v25 = vadd.f32 %v2574_v1, %v2486_v10 }
 0x30f   : > { %v3578_v29 = vpop.f32.mrf.mxu1 }
 0x328   : > { %v2693_v31 = vpop.f32.mrf.mxu0 }
 0x329   : > { %v2694_v4 = vadd.f32 %v2693_v31, %v2575_v25 }
 0x32a   : > { %v3613_v63 = vpop.f32.mrf.mxu0 }
 0x32f   : > { %v2780_v33 = vpop.f32.mrf.mxu1 }
 0x330   : > { %v2781_v15 = vadd.f32 %v2780_v33, %v2694_v4 }
 0x331   : > { %v3648_v14 = vpop.f32.mrf.mxu1 }
 0x332   : > { %v2910_v32 = vclamps-f32 %v2781_v15, 2.5 }
 0x334   : > { %2786 = vst [vmem:[#allocation9] sm:$0xff] %v2910_v32 }
 0x335 PF: > { %p3675_p4 = scmp.eq.s32.totalorder %s3972_s24, 1  ;;  %s3912_s11 = smov [#allocation9]  }
 0x336   : > { %s2796_s14 = sshll.u32 %s3912_s11, 4  ;;  %s2797_s14 = int_to_ptr.vmem [resolvable:$true] %s2796_s14 }
 0x337   : > { %s3816_s12 = scalar_lea.vmem %s2797_s14, 128  ;;  %p3823_p9 = scmp.lt.s32.totalorder %s2797_s14, %s2797_s14 }
 0x338   : > { %p3817_p7 = scmp.ne.s32.totalorder %s2797_s14, %s3816_s12  ;;  %p3824_p10 = scmp.lt.s32.totalorder %s3816_s12, %s3816_s12 }
 0x33a   : > { %p3818_p12 = pnand %p3817_p7, %p3675_p4  ;;  %p3825_p11 = por %p3824_p10, %p3823_p9 }
 0x33c   : > { %p3819_p8 = pneg %p3818_p12 }
 0x33e   : > { %p3826_p13 = pnand %p3825_p11, %p3819_p8 }
 0x340   : > { %3829 = shalt.err (!%p3826_p13)
}
 0x341   : > { %3658 = dma.vmem_to_hbm [thread:$0]  (%p3675_p4), %s2797_s14, 128, %s5723_s5, [#allocation5]  }
 0x342   : > { %3877 = dma.done.wait (%p3675_p4), [#allocation5], 128  }
 0x343   : > { %3879 = vsyncadd (%p3675_p4), [#allocation5], 4294967168 }
 0x344 PF: > { %s22_s23 = sadd.s32 1, %s3902_s23   ;;  %s6083_s18 = smov %s3886_s19 }
 0x345   : > { %p19_p0 = scmp.ge.s32.totalorder %s22_s23, 4   ;;  %s6084_s19 = smov %s3890_s20 }
 0x346   : > { %s6085_s20 = smov %s4019_s16  ;;  %s6086_s21 = smov %s3898_s22 }
 0x347   : > { %s6087_s22 = smov %s6089_s30  ;;  %21 = sbr.rel (!%p19_p0) target bundleno = 9 (0x9), region = 103 }
 0x34c   :  { %2809 = vsyncpa [#allocation4], 1 }
 0x34d   :  { %2811 = vsyncpa [#allocation4 + $0x1], 1 }
 0x34e   :  { %2812 = vsyncpa [#allocation7], 1 }
 0x34f   :  { %2814 = vsyncpa [#allocation7 + $0x1], 1 }
 0x350   :  { %2815 = vsyncpa [#allocation5], 1 }
 0x351   :  { %2817 = vsyncpa [#allocation5 + $0x1], 1 }

</bundles_post_ra>
